<compile_context>
chip_gen: v6e
topology: v6e:2x2x1
jax: 0.10.0
libtpu: 0.0.40
codegen_flags: <defaults>
</compile_context>

<pallas_src>
import jax
import jax.numpy as jnp
from jax.experimental import pallas as pl
from jax.experimental.pallas import tpu as pltpu


def _ceil_to(a, m):
    return ((a + m - 1) // m) * m


def _largest_divisor_tile(total, cap):
    """Largest multiple of 128 that divides `total` (a multiple of 128), <= cap."""
    nb = total // 128
    cb = max(1, min(cap // 128, nb))
    while nb % cb:
        cb -= 1
    return cb * 128


# ---------------------------------------------------------------------------
# Kernels.  acc layout: [:, 0:fp] = x rows (self term), [:, fp:2fp] = agg_in,
# [:, 2fp:3fp] = agg_out.  Finalize: one fused bf16 matmul against W_cat + b.
# ---------------------------------------------------------------------------

def _finalize(acc_ref, w_ref, b_ref, o_ref):
    h = jnp.dot(acc_ref[...].astype(jnp.bfloat16), w_ref[...],
                preferred_element_type=jnp.float32)
    o_ref[...] = h + b_ref[...]


def _kernel_resident_x(x_ref, a_in_ref, a_out_ref, w_ref, b_ref, o_ref, acc_ref):
    """x fully VMEM-resident (DMA'd once); sliced per tile in-kernel."""
    i = pl.program_id(0)
    k = pl.program_id(1)
    fp = x_ref.shape[1]
    tm = acc_ref.shape[0]
    tk = a_in_ref.shape[1]

    @pl.when(k == 0)
    def _init():
        r0 = pl.multiple_of(i * tm, tm)
        acc_ref[:, :fp] = x_ref[pl.ds(r0, tm), :].astype(jnp.float32)
        acc_ref[:, fp:] = jnp.zeros((tm, 2 * fp), jnp.float32)

    # two aggregation dots back-to-back on the same x RHS tile (bf16 in, f32 acc)
    c0 = pl.multiple_of(k * tk, tk)
    xk = x_ref[pl.ds(c0, tk), :]
    acc_ref[:, fp:2 * fp] += jnp.dot(a_in_ref[...], xk,
                                     preferred_element_type=jnp.float32)
    acc_ref[:, 2 * fp:] += jnp.dot(a_out_ref[...], xk,
                                   preferred_element_type=jnp.float32)

    @pl.when(k == pl.num_programs(1) - 1)
    def _fin():
        _finalize(acc_ref, w_ref, b_ref, o_ref)


def _kernel_streamed_x(x_i_ref, x_k_ref, a_in_ref, a_out_ref, w_ref, b_ref,
                       o_ref, acc_ref):
    """Fallback for graphs whose node features do not fit resident in VMEM."""
    k = pl.program_id(1)
    fp = x_i_ref.shape[1]

    @pl.when(k == 0)
    def _init():
        acc_ref[:, :fp] = x_i_ref[...].astype(jnp.float32)
        acc_ref[:, fp:] = jnp.zeros((acc_ref.shape[0], 2 * fp), jnp.float32)

    xk = x_k_ref[...]
    acc_ref[:, fp:2 * fp] += jnp.dot(a_in_ref[...], xk,
                                     preferred_element_type=jnp.float32)
    acc_ref[:, 2 * fp:] += jnp.dot(a_out_ref[...], xk,
                                   preferred_element_type=jnp.float32)

    @pl.when(k == pl.num_programs(1) - 1)
    def _fin():
        _finalize(acc_ref, w_ref, b_ref, o_ref)


# ---------------------------------------------------------------------------
# Graph preprocessing: dense normalized adjacencies, built padded + bf16
# directly so no extra f32->bf16 repack pass runs over the N^2 arrays.
# ---------------------------------------------------------------------------

def build_norm_adjacencies(edge_index, num_nodes, n_pad=None, dtype=jnp.bfloat16):
    """A_in[i, j]  = (#edges j->i) / indeg(i)   (source_to_target mean aggr)
       A_out[i, j] = (#edges i->j) / outdeg(i)  (target_to_source mean aggr)
       Rows with zero degree are all-zero (matches PyG scatter-mean).
       Built directly at the padded shape (rows/cols >= num_nodes are zero)."""
    del num_nodes  # padding rows/cols receive no edges, so they stay zero
    if n_pad is None:
        n_pad = edge_index.shape[1]  # unused branch guard; callers pass n_pad
    src, dst = edge_index[0], edge_index[1]

    def norm(rows, cols):
        cnt = jnp.zeros((n_pad, n_pad), jnp.float32).at[rows, cols].add(1.0)
        deg = cnt.sum(axis=1, keepdims=True)
        inv = jnp.where(deg > 0, 1.0 / jnp.maximum(deg, 1.0), 0.0)
        return (cnt * inv).astype(dtype)

    return norm(dst, src), norm(src, dst)


# ---------------------------------------------------------------------------
# Wrapper.
# ---------------------------------------------------------------------------

def dir_sage_conv(x, edge_index, params, alpha, *, tm=512, tk=2048):
    """x: (N, F_in) f32, edge_index: (2, E) int32.  Returns (N, F_out) f32."""
    n, f_in = x.shape
    f_out = params["w_self"].shape[1]

    fp = _ceil_to(f_in, 128)        # padded F_in  (lane-dense)
    fo = _ceil_to(f_out, 128)       # padded F_out (lane-dense, unmasked stores)
    n_pad = _ceil_to(n, 128)        # pad N only to 128 (not to tk)

    # --- VMEM budget per chip generation (v7x: 64 MiB/TC, v5e/v6e: 128 MiB)
    try:
        phys_vmem = int(pltpu.get_tpu_info().vmem_capacity_bytes)
    except Exception:
        phys_vmem = 64 << 20        # conservative (v7x-sized) fallback
    budget = min(phys_vmem - (16 << 20), 100 << 20)

    # --- tile sizes: multiples of 128 that divide n_pad (no A over-padding)
    tm_ = _largest_divisor_tile(n_pad, tm)
    tk_ = _largest_divisor_tile(n_pad, tk)
    # keep >= 2 row tiles when possible so the "parallel" axis feeds both v7x TCs
    if n_pad // tm_ < 2 and n_pad >= 256:
        tm_ = _largest_divisor_tile(n_pad, max(128, n_pad // 2))

    # x resident in VMEM if its bf16 copy is comfortably inside the budget
    resident_x = (n_pad * fp * 2) <= budget // 4

    def footprint(tmv, tkv):
        a_tiles = 2 * (2 * tmv * tkv * 2)          # A_in + A_out bf16, double-buffered
        w = (3 * fp * fo) * 2 + fo * 4             # W_cat bf16 (single buf) + bias f32
        acc = tmv * 3 * fp * 4                     # f32 accumulator scratch
        outb = 2 * tmv * fo * 4                    # output tile f32, double-buffered
        xb_ = n_pad * fp * 2 if resident_x else 2 * (tmv + tkv) * fp * 2
        return a_tiles + w + acc + outb + xb_

    # auto-shrink tiles until the footprint fits the per-chip budget
    while footprint(tm_, tk_) > budget and (tm_ > 128 or tk_ > 128):
        if tk_ >= tm_ and tk_ > 128:
            tk_ = _largest_divisor_tile(n_pad, tk_ - 128)
        elif tm_ > 128:
            tm_ = _largest_divisor_tile(n_pad, tm_ - 128)
        else:
            break
    vmem_limit = int(min(budget, max(footprint(tm_, tk_) + (8 << 20), 32 << 20)))

    # --- build padded bf16 operands directly
    xb = jnp.zeros((n_pad, fp), jnp.bfloat16).at[:n, :f_in].set(
        x.astype(jnp.bfloat16))
    a_in, a_out = build_norm_adjacencies(edge_index, n, n_pad, jnp.bfloat16)

    # --- fold alpha into the fused weights (bf16) / bias (f32, tiny)
    w_cat = jnp.zeros((3 * fp, fo), jnp.float32)
    w_cat = w_cat.at[0:f_in, :f_out].set(params["w_self"])
    w_cat = w_cat.at[fp:fp + f_in, :f_out].set((1.0 - alpha) * params["w_fwd"])
    w_cat = w_cat.at[2 * fp:2 * fp + f_in, :f_out].set(alpha * params["w_bwd"])
    w_cat = w_cat.astype(jnp.bfloat16)
    b_cat = jnp.zeros((1, fo), jnp.float32).at[:, :f_out].set(
        params["b_self"] + (1.0 - alpha) * params["b_fwd"]
        + alpha * params["b_bwd"])

    grid = (n_pad // tm_, n_pad // tk_)

    def run(single_buffer):
        def const_spec(shape):
            if single_buffer:
                return pl.BlockSpec(shape, lambda i, k: (0, 0),
                                    pipeline_mode=pl.Buffered(1))
            return pl.BlockSpec(shape, lambda i, k: (0, 0))

        a_specs = [pl.BlockSpec((tm_, tk_), lambda i, k: (i, k)),   # A_in tile
                   pl.BlockSpec((tm_, tk_), lambda i, k: (i, k))]   # A_out tile
        wb_specs = [const_spec((3 * fp, fo)),                       # fused weights
                    const_spec((1, fo))]                            # fused bias

        if resident_x:
            kernel = _kernel_resident_x
            in_specs = [const_spec((n_pad, fp))] + a_specs + wb_specs
            args = (xb, a_in, a_out, w_cat, b_cat)
        else:
            kernel = _kernel_streamed_x
            in_specs = ([pl.BlockSpec((tm_, fp), lambda i, k: (i, 0)),
                         pl.BlockSpec((tk_, fp), lambda i, k: (k, 0))]
                        + a_specs + wb_specs)
            args = (xb, xb, a_in, a_out, w_cat, b_cat)

        return pl.pallas_call(
            kernel,
            out_shape=jax.ShapeDtypeStruct((n_pad, fo), jnp.float32),
            grid_spec=pltpu.PrefetchScalarGridSpec(
                num_scalar_prefetch=0,
                grid=grid,
                in_specs=in_specs,
                out_specs=pl.BlockSpec((tm_, fo), lambda i, k: (i, 0)),
                scratch_shapes=[pltpu.VMEM((tm_, 3 * fp), jnp.float32)],
            ),
            compiler_params=pltpu.CompilerParams(
                dimension_semantics=("parallel", "arbitrary"),
                vmem_limit_bytes=vmem_limit,
            ),
        )(*args)

    try:
        out = run(single_buffer=True)
    except Exception:
        # pl.Buffered(1) unavailable / rejected on this Pallas version: fall
        # back to default double-buffered specs (identical semantics).
        out = run(single_buffer=False)

    return out[:n, :f_out]


# ---------------------------------------------------------------------------
# Parameters / reference / demo.
# ---------------------------------------------------------------------------

def init_params(key, input_dim, output_dim):
    ks = jax.random.split(key, 6)
    scale = 1.0 / jnp.sqrt(jnp.float32(input_dim))
    # torch Linear stores weight as (out, in); we keep the transposed (in, out)
    def w(k):
        return (jax.random.uniform(k, (input_dim, output_dim), jnp.float32,
                                   -1.0, 1.0) * scale)
    def b(k):
        return (jax.random.uniform(k, (1, output_dim), jnp.float32,
                                   -1.0, 1.0) * scale)
    return {
        "w_self": w(ks[0]), "b_self": b(ks[1]),
        "w_fwd":  w(ks[2]), "b_fwd":  b(ks[3]),
        "w_bwd":  w(ks[4]), "b_bwd":  b(ks[5]),
    }


def reference(x, edge_index, p, alpha):
    # f32 math on the same bf16-rounded x / A the kernel consumes; weights stay
    # f32 here (the kernel's bf16 weight/acc rounding stays inside tolerance).
    n = x.shape[0]
    a_in, a_out = build_norm_adjacencies(edge_index, n, n, jnp.float32)
    xf = x.astype(jnp.bfloat16).astype(jnp.float32)
    ai = a_in.astype(jnp.bfloat16).astype(jnp.float32)
    ao = a_out.astype(jnp.bfloat16).astype(jnp.float32)
    h_self = xf @ p["w_self"] + p["b_self"]
    h_fwd = (ai @ xf) @ p["w_fwd"] + p["b_fwd"]
    h_bwd = (ao @ xf) @ p["w_bwd"] + p["b_bwd"]
    return h_self + (1.0 - alpha) * h_fwd + alpha * h_bwd


if __name__ == "__main__":
    key = jax.random.PRNGKey(0)
    k_x, k_p, k_e = jax.random.split(key, 3)

    num_nodes = 16
    input_dim = 32
    output_dim = 32
    num_edges = 48
    alpha = 0.5

    x = jax.random.normal(k_x, (num_nodes, input_dim), jnp.float32)
    edge_index = jax.random.randint(k_e, (2, num_edges), 0, num_nodes,
                                    dtype=jnp.int32)
    params = init_params(k_p, input_dim, output_dim)

    out = dir_sage_conv(x, edge_index, params, alpha)
    out = jax.block_until_ready(out)

    ref = reference(x, edge_index, params, alpha)
    assert out.shape == (num_nodes, output_dim)
    assert jnp.allclose(out, ref, atol=2e-2, rtol=2e-2), (
        float(jnp.max(jnp.abs(out - ref))))

    print("KERNEL_OK")
</pallas_src>

<mosaic_0001>
module attributes {stable_mosaic.version = 11 : i64} {
  func.func @_kernel_resident_x(%arg0: i32, %arg1: i32, %arg2: memref<128x128xbf16, #tpu.memory_space<vmem>>, %arg3: memref<128x128xbf16, #tpu.memory_space<vmem>>, %arg4: memref<128x128xbf16, #tpu.memory_space<vmem>>, %arg5: memref<384x128xbf16, #tpu.memory_space<vmem>>, %arg6: memref<1x128xf32, #tpu.memory_space<vmem>>, %arg7: memref<128x128xf32, #tpu.memory_space<vmem>>, %arg8: memref<128x384xf32, #tpu.memory_space<vmem>>) attributes {dimension_semantics = [#tpu.dimension_semantics<parallel>, #tpu.dimension_semantics<arbitrary>], iteration_bounds = array<i64: 1, 1>, scalar_prefetch = 0 : i64, scratch_operands = 1 : i64, tpu.core_type = #tpu.core_type<tc>, window_params = [{pipeline_mode = #tpu.pipeline_mode<synchronous>, transform_indices = @transform_0, window_bounds = array<i64: 128, 128>}, {transform_indices = @transform_1, window_bounds = array<i64: 128, 128>}, {transform_indices = @transform_2, window_bounds = array<i64: 128, 128>}, {pipeline_mode = #tpu.pipeline_mode<synchronous>, transform_indices = @transform_3, window_bounds = array<i64: 384, 128>}, {pipeline_mode = #tpu.pipeline_mode<synchronous>, transform_indices = @transform_4, window_bounds = array<i64: 1, 128>}, {transform_indices = @transform_5, window_bounds = array<i64: 128, 128>}]} {
    %c0_i32 = arith.constant 0 : i32
    %0 = arith.cmpi eq, %arg1, %c0_i32 : i32
    %1 = arith.extui %0 : i1 to i32
    %c0_i32_0 = arith.constant 0 : i32
    %2 = arith.cmpi ne, %1, %c0_i32_0 : i32
    scf.if %2 {
      %c128_i32_14 = arith.constant 128 : i32
      %20 = arith.muli %arg0, %c128_i32_14 : i32
      %21 = tpu.assume_multiple %20, 128 : i32
      %22 = arith.index_cast %21 : i32 to index
      %c0_15 = arith.constant 0 : index
      %23 = vector.load %arg2[%22, %c0_15] : memref<128x128xbf16, #tpu.memory_space<vmem>>, vector<128x128xbf16>
      %24 = arith.extf %23 : vector<128x128xbf16> to vector<128x128xf32>
      %c0_16 = arith.constant 0 : index
      %c0_17 = arith.constant 0 : index
      %25 = vector.load %arg8[%c0_16, %c0_17] : memref<128x384xf32, #tpu.memory_space<vmem>>, vector<128x128xf32>
      tpu.vector_store %arg8[%c0_16, %c0_17], %24 {strides = array<i32>} : memref<128x384xf32, #tpu.memory_space<vmem>>, vector<128x128xf32>,
      %cst_18 = arith.constant 0.000000e+00 : f32
      %26 = vector.broadcast %cst_18 : f32 to vector<128x256xf32>
      %c0_19 = arith.constant 0 : index
      %c128_20 = arith.constant 128 : index
      %27 = vector.load %arg8[%c0_19, %c128_20] : memref<128x384xf32, #tpu.memory_space<vmem>>, vector<128x256xf32>
      tpu.vector_store %arg8[%c0_19, %c128_20], %26 {strides = array<i32>} : memref<128x384xf32, #tpu.memory_space<vmem>>, vector<128x256xf32>,
    } else {
    }
    %c128_i32 = arith.constant 128 : i32
    %3 = arith.muli %arg1, %c128_i32 : i32
    %4 = tpu.assume_multiple %3, 128 : i32
    %5 = arith.index_cast %4 : i32 to index
    %c0 = arith.constant 0 : index
    %6 = vector.load %arg2[%5, %c0] : memref<128x128xbf16, #tpu.memory_space<vmem>>, vector<128x128xbf16>
    %c0_1 = arith.constant 0 : index
    %c128 = arith.constant 128 : index
    %7 = vector.load %arg8[%c0_1, %c128] : memref<128x384xf32, #tpu.memory_space<vmem>>, vector<128x128xf32>
    %c0_2 = arith.constant 0 : index
    %c0_3 = arith.constant 0 : index
    %8 = vector.load %arg3[%c0_2, %c0_3] : memref<128x128xbf16, #tpu.memory_space<vmem>>, vector<128x128xbf16>
    %cst = arith.constant dense<0.000000e+00> : vector<128x128xf32>
    %9 = tpu.matmul %8, %6, %cst {dimension_numbers = #tpu.dot_dimension_numbers<[1], [0], [0], [1], [0, 0, 1, 1], [], []>} : vector<128x128xbf16>, vector<128x128xbf16>, vector<128x128xf32> -> vector<128x128xf32>
    %10 = arith.addf %7, %9 : vector<128x128xf32>
    %c0_4 = arith.constant 0 : index
    %c128_5 = arith.constant 128 : index
    %11 = vector.load %arg8[%c0_4, %c128_5] : memref<128x384xf32, #tpu.memory_space<vmem>>, vector<128x128xf32>
    tpu.vector_store %arg8[%c0_4, %c128_5], %10 {strides = array<i32>} : memref<128x384xf32, #tpu.memory_space<vmem>>, vector<128x128xf32>,
    %c0_6 = arith.constant 0 : index
    %c256 = arith.constant 256 : index
    %12 = vector.load %arg8[%c0_6, %c256] : memref<128x384xf32, #tpu.memory_space<vmem>>, vector<128x128xf32>
    %c0_7 = arith.constant 0 : index
    %c0_8 = arith.constant 0 : index
    %13 = vector.load %arg4[%c0_7, %c0_8] : memref<128x128xbf16, #tpu.memory_space<vmem>>, vector<128x128xbf16>
    %cst_9 = arith.constant dense<0.000000e+00> : vector<128x128xf32>
    %14 = tpu.matmul %13, %6, %cst_9 {dimension_numbers = #tpu.dot_dimension_numbers<[1], [0], [0], [1], [0, 0, 1, 1], [], []>} : vector<128x128xbf16>, vector<128x128xbf16>, vector<128x128xf32> -> vector<128x128xf32>
    %15 = arith.addf %12, %14 : vector<128x128xf32>
    %c0_10 = arith.constant 0 : index
    %c256_11 = arith.constant 256 : index
    %16 = vector.load %arg8[%c0_10, %c256_11] : memref<128x384xf32, #tpu.memory_space<vmem>>, vector<128x128xf32>
    tpu.vector_store %arg8[%c0_10, %c256_11], %15 {strides = array<i32>} : memref<128x384xf32, #tpu.memory_space<vmem>>, vector<128x128xf32>,
    %c0_i32_12 = arith.constant 0 : i32
    %17 = arith.cmpi eq, %arg1, %c0_i32_12 : i32
    %18 = arith.extui %17 : i1 to i32
    %c0_i32_13 = arith.constant 0 : i32
    %19 = arith.cmpi ne, %18, %c0_i32_13 : i32
    scf.if %19 {
      %c0_14 = arith.constant 0 : index
      %c0_15 = arith.constant 0 : index
      %20 = vector.load %arg8[%c0_14, %c0_15] : memref<128x384xf32, #tpu.memory_space<vmem>>, vector<128x384xf32>
      %21 = arith.truncf %20 : vector<128x384xf32> to vector<128x384xbf16>
      %c0_16 = arith.constant 0 : index
      %c0_17 = arith.constant 0 : index
      %22 = vector.load %arg5[%c0_16, %c0_17] : memref<384x128xbf16, #tpu.memory_space<vmem>>, vector<384x128xbf16>
      %cst_18 = arith.constant dense<0.000000e+00> : vector<128x128xf32>
      %23 = tpu.matmul %21, %22, %cst_18 {dimension_numbers = #tpu.dot_dimension_numbers<[1], [0], [0], [1], [0, 0, 1, 1], [], []>} : vector<128x384xbf16>, vector<384x128xbf16>, vector<128x128xf32> -> vector<128x128xf32>
      %c0_19 = arith.constant 0 : index
      %c0_20 = arith.constant 0 : index
      %24 = vector.load %arg6[%c0_19, %c0_20] : memref<1x128xf32, #tpu.memory_space<vmem>>, vector<1x128xf32>
      %25 = vector.broadcast %24 : vector<1x128xf32> to vector<128x128xf32>
      %26 = arith.addf %23, %25 : vector<128x128xf32>
      %c0_21 = arith.constant 0 : index
      %c0_22 = arith.constant 0 : index
      %27 = vector.load %arg7[%c0_21, %c0_22] : memref<128x128xf32, #tpu.memory_space<vmem>>, vector<128x128xf32>
      tpu.vector_store %arg7[%c0_21, %c0_22], %26 {strides = array<i32>} : memref<128x128xf32, #tpu.memory_space<vmem>>, vector<128x128xf32>,
    } else {
    }
    return
  }
  func.func @transform_0(%arg0: i32, %arg1: i32) -> (i32, i32) {
    %c0_i32 = arith.constant 0 : i32
    %c0_i32_0 = arith.constant 0 : i32
    %c0_i32_1 = arith.constant 0 : i32
    return %c0_i32, %c0_i32_0 : i32, i32
  }
  func.func @transform_1(%arg0: i32, %arg1: i32) -> (i32, i32) {
    %c0_i32 = arith.constant 0 : i32
    return %arg0, %arg1 : i32, i32
  }
  func.func @transform_2(%arg0: i32, %arg1: i32) -> (i32, i32) {
    %c0_i32 = arith.constant 0 : i32
    return %arg0, %arg1 : i32, i32
  }
  func.func @transform_3(%arg0: i32, %arg1: i32) -> (i32, i32) {
    %c0_i32 = arith.constant 0 : i32
    %c0_i32_0 = arith.constant 0 : i32
    %c0_i32_1 = arith.constant 0 : i32
    return %c0_i32, %c0_i32_0 : i32, i32
  }
  func.func @transform_4(%arg0: i32, %arg1: i32) -> (i32, i32) {
    %c0_i32 = arith.constant 0 : i32
    %c0_i32_0 = arith.constant 0 : i32
    %c0_i32_1 = arith.constant 0 : i32
    return %c0_i32, %c0_i32_0 : i32, i32
  }
  func.func @transform_5(%arg0: i32, %arg1: i32) -> (i32, i32) {
    %c0_i32 = arith.constant 0 : i32
    %c0_i32_0 = arith.constant 0 : i32
    return %arg0, %c0_i32 : i32, i32
  }
}

module attributes {stable_mosaic.version = 11 : i64} {
  func.func @_kernel_resident_x(%arg0: i32, %arg1: i32, %arg2: memref<128x128xbf16, #tpu.memory_space<vmem>>, %arg3: memref<128x128xbf16, #tpu.memory_space<vmem>>, %arg4: memref<128x128xbf16, #tpu.memory_space<vmem>>, %arg5: memref<384x128xbf16, #tpu.memory_space<vmem>>, %arg6: memref<1x128xf32, #tpu.memory_space<vmem>>, %arg7: memref<128x128xf32, #tpu.memory_space<vmem>>, %arg8: memref<128x384xf32, #tpu.memory_space<vmem>>) attributes {dimension_semantics = [#tpu.dimension_semantics<parallel>, #tpu.dimension_semantics<arbitrary>], iteration_bounds = array<i64: 1, 1>, scalar_prefetch = 0 : i64, scratch_operands = 1 : i64, tpu.core_type = #tpu.core_type<tc>, window_params = [{pipeline_mode = #tpu.pipeline_mode<synchronous>, transform_indices = @transform_0, window_bounds = array<i64: 128, 128>}, {transform_indices = @transform_1, window_bounds = array<i64: 128, 128>}, {transform_indices = @transform_2, window_bounds = array<i64: 128, 128>}, {pipeline_mode = #tpu.pipeline_mode<synchronous>, transform_indices = @transform_3, window_bounds = array<i64: 384, 128>}, {pipeline_mode = #tpu.pipeline_mode<synchronous>, transform_indices = @transform_4, window_bounds = array<i64: 1, 128>}, {transform_indices = @transform_5, window_bounds = array<i64: 128, 128>}]} {
    %c0_i32 = arith.constant 0 : i32
    %0 = arith.cmpi eq, %arg1, %c0_i32 : i32
    %1 = arith.extui %0 : i1 to i32
    %c0_i32_0 = arith.constant 0 : i32
    %2 = arith.cmpi ne, %1, %c0_i32_0 : i32
    scf.if %2 {
      %c128_i32_14 = arith.constant 128 : i32
      %20 = arith.muli %arg0, %c128_i32_14 : i32
      %21 = tpu.assume_multiple %20, 128 : i32
      %22 = arith.index_cast %21 : i32 to index
      %c0_15 = arith.constant 0 : index
      %23 = vector.load %arg2[%22, %c0_15] : memref<128x128xbf16, #tpu.memory_space<vmem>>, vector<128x128xbf16>
      %24 = arith.extf %23 : vector<128x128xbf16> to vector<128x128xf32>
      %c0_16 = arith.constant 0 : index
      %c0_17 = arith.constant 0 : index
      %25 = vector.load %arg8[%c0_16, %c0_17] : memref<128x384xf32, #tpu.memory_space<vmem>>, vector<128x128xf32>
      tpu.vector_store %arg8[%c0_16, %c0_17], %24 {strides = array<i32>} : memref<128x384xf32, #tpu.memory_space<vmem>>, vector<128x128xf32>,
      %cst_18 = arith.constant 0.000000e+00 : f32
      %26 = vector.broadcast %cst_18 : f32 to vector<128x256xf32>
      %c0_19 = arith.constant 0 : index
      %c128_20 = arith.constant 128 : index
      %27 = vector.load %arg8[%c0_19, %c128_20] : memref<128x384xf32, #tpu.memory_space<vmem>>, vector<128x256xf32>
      tpu.vector_store %arg8[%c0_19, %c128_20], %26 {strides = array<i32>} : memref<128x384xf32, #tpu.memory_space<vmem>>, vector<128x256xf32>,
    } else {
    }
    %c128_i32 = arith.constant 128 : i32
    %3 = arith.muli %arg1, %c128_i32 : i32
    %4 = tpu.assume_multiple %3, 128 : i32
    %5 = arith.index_cast %4 : i32 to index
    %c0 = arith.constant 0 : index
    %6 = vector.load %arg2[%5, %c0] : memref<128x128xbf16, #tpu.memory_space<vmem>>, vector<128x128xbf16>
    %c0_1 = arith.constant 0 : index
    %c128 = arith.constant 128 : index
    %7 = vector.load %arg8[%c0_1, %c128] : memref<128x384xf32, #tpu.memory_space<vmem>>, vector<128x128xf32>
    %c0_2 = arith.constant 0 : index
    %c0_3 = arith.constant 0 : index
    %8 = vector.load %arg3[%c0_2, %c0_3] : memref<128x128xbf16, #tpu.memory_space<vmem>>, vector<128x128xbf16>
    %cst = arith.constant dense<0.000000e+00> : vector<128x128xf32>
    %9 = tpu.matmul %8, %6, %cst {dimension_numbers = #tpu.dot_dimension_numbers<[1], [0], [0], [1], [0, 0, 1, 1], [], []>} : vector<128x128xbf16>, vector<128x128xbf16>, vector<128x128xf32> -> vector<128x128xf32>
    %10 = arith.addf %7, %9 : vector<128x128xf32>
    %c0_4 = arith.constant 0 : index
    %c128_5 = arith.constant 128 : index
    %11 = vector.load %arg8[%c0_4, %c128_5] : memref<128x384xf32, #tpu.memory_space<vmem>>, vector<128x128xf32>
    tpu.vector_store %arg8[%c0_4, %c128_5], %10 {strides = array<i32>} : memref<128x384xf32, #tpu.memory_space<vmem>>, vector<128x128xf32>,
    %c0_6 = arith.constant 0 : index
    %c256 = arith.constant 256 : index
    %12 = vector.load %arg8[%c0_6, %c256] : memref<128x384xf32, #tpu.memory_space<vmem>>, vector<128x128xf32>
    %c0_7 = arith.constant 0 : index
    %c0_8 = arith.constant 0 : index
    %13 = vector.load %arg4[%c0_7, %c0_8] : memref<128x128xbf16, #tpu.memory_space<vmem>>, vector<128x128xbf16>
    %cst_9 = arith.constant dense<0.000000e+00> : vector<128x128xf32>
    %14 = tpu.matmul %13, %6, %cst_9 {dimension_numbers = #tpu.dot_dimension_numbers<[1], [0], [0], [1], [0, 0, 1, 1], [], []>} : vector<128x128xbf16>, vector<128x128xbf16>, vector<128x128xf32> -> vector<128x128xf32>
    %15 = arith.addf %12, %14 : vector<128x128xf32>
    %c0_10 = arith.constant 0 : index
    %c256_11 = arith.constant 256 : index
    %16 = vector.load %arg8[%c0_10, %c256_11] : memref<128x384xf32, #tpu.memory_space<vmem>>, vector<128x128xf32>
    tpu.vector_store %arg8[%c0_10, %c256_11], %15 {strides = array<i32>} : memref<128x384xf32, #tpu.memory_space<vmem>>, vector<128x128xf32>,
    %c0_i32_12 = arith.constant 0 : i32
    %17 = arith.cmpi eq, %arg1, %c0_i32_12 : i32
    %18 = arith.extui %17 : i1 to i32
    %c0_i32_13 = arith.constant 0 : i32
    %19 = arith.cmpi ne, %18, %c0_i32_13 : i32
    scf.if %19 {
      %c0_14 = arith.constant 0 : index
      %c0_15 = arith.constant 0 : index
      %20 = vector.load %arg8[%c0_14, %c0_15] : memref<128x384xf32, #tpu.memory_space<vmem>>, vector<128x384xf32>
      %21 = arith.truncf %20 : vector<128x384xf32> to vector<128x384xbf16>
      %c0_16 = arith.constant 0 : index
      %c0_17 = arith.constant 0 : index
      %22 = vector.load %arg5[%c0_16, %c0_17] : memref<384x128xbf16, #tpu.memory_space<vmem>>, vector<384x128xbf16>
      %cst_18 = arith.constant dense<0.000000e+00> : vector<128x128xf32>
      %23 = tpu.matmul %21, %22, %cst_18 {dimension_numbers = #tpu.dot_dimension_numbers<[1], [0], [0], [1], [0, 0, 1, 1], [], []>} : vector<128x384xbf16>, vector<384x128xbf16>, vector<128x128xf32> -> vector<128x128xf32>
      %c0_19 = arith.constant 0 : index
      %c0_20 = arith.constant 0 : index
      %24 = vector.load %arg6[%c0_19, %c0_20] : memref<1x128xf32, #tpu.memory_space<vmem>>, vector<1x128xf32>
      %25 = vector.broadcast %24 : vector<1x128xf32> to vector<128x128xf32>
      %26 = arith.addf %23, %25 : vector<128x128xf32>
      %c0_21 = arith.constant 0 : index
      %c0_22 = arith.constant 0 : index
      %27 = vector.load %arg7[%c0_21, %c0_22] : memref<128x128xf32, #tpu.memory_space<vmem>>, vector<128x128xf32>
      tpu.vector_store %arg7[%c0_21, %c0_22], %26 {strides = array<i32>} : memref<128x128xf32, #tpu.memory_space<vmem>>, vector<128x128xf32>,
    } else {
    }
    return
  }
  func.func @transform_0(%arg0: i32, %arg1: i32) -> (i32, i32) {
    %c0_i32 = arith.constant 0 : i32
    %c0_i32_0 = arith.constant 0 : i32
    %c0_i32_1 = arith.constant 0 : i32
    return %c0_i32, %c0_i32_0 : i32, i32
  }
  func.func @transform_1(%arg0: i32, %arg1: i32) -> (i32, i32) {
    %c0_i32 = arith.constant 0 : i32
    return %arg0, %arg1 : i32, i32
  }
  func.func @transform_2(%arg0: i32, %arg1: i32) -> (i32, i32) {
    %c0_i32 = arith.constant 0 : i32
    return %arg0, %arg1 : i32, i32
  }
  func.func @transform_3(%arg0: i32, %arg1: i32) -> (i32, i32) {
    %c0_i32 = arith.constant 0 : i32
    %c0_i32_0 = arith.constant 0 : i32
    %c0_i32_1 = arith.constant 0 : i32
    return %c0_i32, %c0_i32_0 : i32, i32
  }
  func.func @transform_4(%arg0: i32, %arg1: i32) -> (i32, i32) {
    %c0_i32 = arith.constant 0 : i32
    %c0_i32_0 = arith.constant 0 : i32
    %c0_i32_1 = arith.constant 0 : i32
    return %c0_i32, %c0_i32_0 : i32, i32
  }
  func.func @transform_5(%arg0: i32, %arg1: i32) -> (i32, i32) {
    %c0_i32 = arith.constant 0 : i32
    %c0_i32_0 = arith.constant 0 : i32
    return %arg0, %c0_i32 : i32, i32
  }
}

</mosaic_0001>

<bundles_post_ra>
// kernel: tpu_custom_call.1
= control target key start
LH: loop header
LB: loop body
LE: loop exit
PB: predicated region body
PF: predicated region fallthrough
CT: control target
= control target key end

     0   :  { %10 = vsyncpa [#allocation4], 0  ;;  %s1708_s0 = inlined_call_operand.hbm [shape: bf16[128,128], index: 0, kind: input, shape index: {}]   ;;  %s1709_s1 = inlined_call_operand.hbm [shape: bf16[128,128], index: 1, kind: input, shape index: {}]   ;;  %s1710_s2 = inlined_call_operand.hbm [shape: bf16[128,128], index: 2, kind: input, shape index: {}]   ;;  %s1711_s3 = inlined_call_operand.hbm [shape: bf16[384,128], index: 3, kind: input, shape index: {}]   ;;  %s1712_s4 = inlined_call_operand.vmem [shape: f32[1,128], index: 4, kind: input, shape index: {}]   ;;  %s1713_s5 = inlined_call_operand.hbm [shape: f32[128,128], index: 5, kind: output, shape index: {}]  }
   0x1   :  { %11 = vsyncpa [#allocation7], 0 }
   0x2   :  { %12 = vsyncpa [#allocation10], 0 }
   0x3   :  { %13 = vsyncpa [#allocation5], 0  ;;  %s1621_s18 = smov [#allocation6]   ;;  %s1622_s20 = smov [#allocation3]  }
   0x4   :  { %s31_s19 = sshll.u32 %s1621_s18, 4  ;;  %s19_s21 = sshll.u32 %s1622_s20, 4  ;;  %s32_s19 = int_to_ptr.vmem [resolvable:$true] %s31_s19  ;;  %s20_s21 = int_to_ptr.vmem [resolvable:$true] %s19_s21 }
   0x5   :  { %s1521_s22 = scalar_lea.vmem %s32_s19, 1024  ;;  %p1526_p1 = scmp.lt.s32.totalorder %s32_s19, %s32_s19 }
   0x6   :  { %p1522_p0 = scmp.ne.s32.totalorder %s32_s19, %s1521_s22  ;;  %p1527_p2 = scmp.lt.s32.totalorder %s1521_s22, %s1521_s22 }
   0x8   :  { %p1528_p3 = por %p1527_p2, %p1526_p1 }
   0xa   :  { %p1529_p4 = pnand %p1528_p3, %p1522_p0 }
   0xc   :  { %1532 = shalt.err (!%p1529_p4)
}
   0xd   :  { %s1623_s23 = smov 64   ;;  %s1624_s24 = smov 4  }
   0xe   :  { %37 = dma.hbm_to_vmem [thread:$0]  %s1709_s1, 1024, %s32_s19, [#allocation7], %s1623_s23, %s1623_s23, %s1624_s24  }
   0xf   :  { %s1541_s27 = scalar_lea.vmem %s20_s21, 1024  ;;  %p1546_p6 = scmp.lt.s32.totalorder %s20_s21, %s20_s21 }
  0x10   :  { %p1542_p5 = scmp.ne.s32.totalorder %s20_s21, %s1541_s27  ;;  %p1547_p7 = scmp.lt.s32.totalorder %s1541_s27, %s1541_s27 }
  0x12   :  { %p1548_p8 = por %p1547_p7, %p1546_p6 }
  0x14   :  { %p1549_p9 = pnand %p1548_p8, %p1542_p5 }
  0x16   :  { %1552 = shalt.err (!%p1549_p9)
}
  0x17   :  { %25 = dma.hbm_to_vmem [thread:$0]  %s1708_s0, 1024, %s20_s21, [#allocation4], %s1623_s23, %s1623_s23, %s1624_s24  }
  0x18   :  { %s1625_s30 = smov [#allocation8]   ;;  %s1626_s7 = smov [#allocation9]  }
  0x19   :  { %s43_s6 = sshll.u32 %s1625_s30, 4  ;;  %s55_s8 = sshll.u32 %s1626_s7, 4  ;;  %s44_s6 = int_to_ptr.vmem [resolvable:$true] %s43_s6  ;;  %s56_s8 = int_to_ptr.vmem [resolvable:$true] %s55_s8 }
  0x1a   :  { %s1561_s1 = scalar_lea.vmem %s44_s6, 1024  ;;  %p1566_p11 = scmp.lt.s32.totalorder %s44_s6, %s44_s6 }
  0x1b   :  { %p1562_p10 = scmp.ne.s32.totalorder %s44_s6, %s1561_s1  ;;  %p1567_p12 = scmp.lt.s32.totalorder %s1561_s1, %s1561_s1 }
  0x1d   :  { %p1568_p13 = por %p1567_p12, %p1566_p11 }
  0x1f   :  { %p1569_p0 = pnand %p1568_p13, %p1562_p10 }
  0x21   :  { %1572 = shalt.err (!%p1569_p0)
}
  0x22   :  { %49 = dma.hbm_to_vmem [thread:$0]  %s1710_s2, 1024, %s44_s6, [#allocation7], %s1623_s23, %s1623_s23, %s1624_s24  }
  0x23   :  { %s1581_s0 = scalar_lea.vmem %s56_s8, 3072  ;;  %p1586_p2 = scmp.lt.s32.totalorder %s56_s8, %s56_s8 }
  0x24   :  { %p1582_p1 = scmp.ne.s32.totalorder %s56_s8, %s1581_s0  ;;  %p1587_p3 = scmp.lt.s32.totalorder %s1581_s0, %s1581_s0 }
  0x26   :  { %p1588_p4 = por %p1587_p3, %p1586_p2 }
  0x28   :  { %p1589_p5 = pnand %p1588_p4, %p1582_p1 }
  0x2a   :  { %1592 = shalt.err (!%p1589_p5)
}
  0x2b   :  { %61 = dma.hbm_to_vmem [thread:$0]  %s1711_s3, 3072, %s56_s8, [#allocation10], %s1623_s23, %s1623_s23, %s1624_s24  }
  0x2c   :  { %1613 = dma.done.wait [#allocation4], 1024  }
  0x2d   :  { %1614 = vsyncadd [#allocation4], 4294966272 }
  0x2e   :  { %1615 = dma.done.wait [#allocation7], 2048  }
  0x2f   :  { %1616 = vsyncadd [#allocation7], 4294965248 }
  0x30   :  { %1617 = dma.done.wait [#allocation10], 3072  }
  0x31   :  { %1618 = vsyncadd [#allocation10], 4294964224  ;;  %v1465_v0 = vld [vmem:[#allocation3 + $0x38] sm:$0xff]   ;;  %v1466_v1 = vld [vmem:[#allocation3 + $0x30] sm:$0xff]  }
  0x32   :  { %1360 = vmatprep.subr.bf16.mxu0 %v1465_v0  ;;  %1392 = vmatprep.subr.bf16.mxu1 %v1465_v0  ;;  %v1467_v2 = vld [vmem:[#allocation3 + $0x28] sm:$0xff]   ;;  %v1468_v3 = vld [vmem:[#allocation3 + $0x20] sm:$0xff]   ;;  %v1469_v6 = vld [vmem:[#allocation3 + $0x18] sm:$0xff]  }
  0x33   :  { %1361 = vmatpush3.bf16.msra.mxu0 %v1465_v0  ;;  %1393 = vmatpush3.bf16.msra.mxu1 %v1465_v0  ;;  %v1473_v4 = vld [vmem:[#allocation6] sm:$0xff]   ;;  %v1470_v7 = vld [vmem:[#allocation3 + $0x10] sm:$0xff]   ;;  %v1471_v8 = vld [vmem:[#allocation3 + $0x8] sm:$0xff]  }
  0x34   :  { %1362 = vmatprep.subr.bf16.mxu0 %v1466_v1  ;;  %1394 = vmatprep.subr.bf16.mxu1 %v1466_v1  ;;  %v1475_v5 = vld [vmem:[#allocation8] sm:$0xff]   ;;  %v1489_v10 = vld [vmem:[#allocation9 + $0x78] sm:$0xff]   ;;  %v1474_v11 = vld [vmem:[#allocation6 + $0x8] sm:$0xff]  }
  0x35   :  { %1376 = vmatprep.mubr.bf16.mxu0 %v1473_v4  ;;  %1408 = vmatprep.mubr.bf16.mxu1 %v1475_v5  ;;  %v1472_v9 = vld [vmem:[#allocation3] sm:$0xff]   ;;  %v1476_v12 = vld [vmem:[#allocation8 + $0x8] sm:$0xff]   ;;  %v1493_v13 = vld [vmem:[#allocation9 + $0xb8] sm:$0xff]  }
  0x36   :  { %v1477_v14 = vld [vmem:[#allocation6 + $0x10] sm:$0xff]   ;;  %v1490_v16 = vld [vmem:[#allocation9 + $0x38] sm:$0xff]   ;;  %v1494_v22 = vld [vmem:[#allocation9 + $0x68] sm:$0xff]  }
  0x37   :  { %1363 = vmatpush3.bf16.msra.mxu0 %v1466_v1  ;;  %1395 = vmatpush3.bf16.msra.mxu1 %v1466_v1  ;;  %v1479_v15 = vld [vmem:[#allocation8 + $0x10] sm:$0xff]   ;;  %v1478_v20 = vld [vmem:[#allocation6 + $0x18] sm:$0xff]   ;;  %v1481_v23 = vld [vmem:[#allocation6 + $0x20] sm:$0xff]  }
  0x38   :  { %1364 = vmatprep.subr.bf16.mxu0 %v1467_v2  ;;  %1396 = vmatprep.subr.bf16.mxu1 %v1467_v2  ;;  %v1491_v17 = vld [vmem:[#allocation9 + $0x70] sm:$0xff]   ;;  %v1480_v21 = vld [vmem:[#allocation8 + $0x18] sm:$0xff]   ;;  %v1483_v24 = vld [vmem:[#allocation8 + $0x20] sm:$0xff]  }
  0x39   :  { %v1496_v18 = vld [vmem:[#allocation9 + $0xb0] sm:$0xff]   ;;  %v1499_v25 = vld [vmem:[#allocation9 + $0xa8] sm:$0xff]   ;;  %v1497_v27 = vld [vmem:[#allocation9 + $0x60] sm:$0xff]  }
  0x3a   :  { %v1492_v19 = vld [vmem:[#allocation9 + $0x30] sm:$0xff]   ;;  %v1495_v26 = vld [vmem:[#allocation9 + $0x28] sm:$0xff]   ;;  %v1502_v28 = vld [vmem:[#allocation9 + $0xa0] sm:$0xff]  }
  0x3b   :  { %1365 = vmatpush3.bf16.msra.mxu0 %v1467_v2  ;;  %1397 = vmatpush3.bf16.msra.mxu1 %v1467_v2  ;;  %v1498_v29 = vld [vmem:[#allocation9 + $0x20] sm:$0xff]   ;;  %v1500_v30 = vld [vmem:[#allocation9 + $0x58] sm:$0xff]   ;;  %v1482_v32 = vld [vmem:[#allocation6 + $0x28] sm:$0xff]  }
  0x3c   :  { %1366 = vmatprep.subr.bf16.mxu0 %v1468_v3  ;;  %1398 = vmatprep.subr.bf16.mxu1 %v1468_v3  ;;  %v1505_v31 = vld [vmem:[#allocation9 + $0x98] sm:$0xff]   ;;  %v1484_v33 = vld [vmem:[#allocation8 + $0x28] sm:$0xff]   ;;  %v1485_v34 = vld [vmem:[#allocation6 + $0x30] sm:$0xff]  }
  0x3d   :  { %v1487_v35 = vld [vmem:[#allocation8 + $0x30] sm:$0xff]   ;;  %v1501_v36 = vld [vmem:[#allocation9 + $0x18] sm:$0xff]   ;;  %v1506_v41 = vld [vmem:[#allocation9 + $0x48] sm:$0xff]  }
  0x3e   :  { %v1503_v37 = vld [vmem:[#allocation9 + $0x50] sm:$0xff]   ;;  %v1486_v39 = vld [vmem:[#allocation6 + $0x38] sm:$0xff]   ;;  %v1507_v43 = vld [vmem:[#allocation9 + $0x8] sm:$0xff]  }
  0x3f   :  { %1367 = vmatpush3.bf16.msra.mxu0 %v1468_v3  ;;  %1399 = vmatpush3.bf16.msra.mxu1 %v1468_v3  ;;  %v1504_v38 = vld [vmem:[#allocation9 + $0x10] sm:$0xff]   ;;  %v1488_v40 = vld [vmem:[#allocation8 + $0x38] sm:$0xff]   ;;  %v1509_v44 = vld [vmem:[#allocation9 + $0x40] sm:$0xff]  }
  0x40   :  { %1368 = vmatprep.subr.bf16.mxu0 %v1469_v6  ;;  %1400 = vmatprep.subr.bf16.mxu1 %v1469_v6  ;;  %v1508_v42 = vld [vmem:[#allocation9 + $0x90] sm:$0xff]   ;;  %v1511_v45 = vld [vmem:[#allocation9 + $0x88] sm:$0xff]   ;;  %v1510_v46 = vld [vmem:[#allocation9] sm:$0xff]  }
  0x41   :  { %v1512_v47 = vld [vmem:[#allocation9 + $0x80] sm:$0xff]  }
  0x42   :  { %v1210_v59 = vld [vmem:[#allocation3] sm:$0xff]  }
  0x43   :  { %1369 = vmatpush3.bf16.msra.mxu0 %v1469_v6  ;;  %1401 = vmatpush3.bf16.msra.mxu1 %v1469_v6 }
  0x44   :  { %1370 = vmatprep.subr.bf16.mxu0 %v1470_v7  ;;  %1402 = vmatprep.subr.bf16.mxu1 %v1470_v7 }
  0x47   :  { %1371 = vmatpush3.bf16.msra.mxu0 %v1470_v7  ;;  %1403 = vmatpush3.bf16.msra.mxu1 %v1470_v7  ;;  %v1241_v7 = vld [vmem:[#allocation3 + $0x8] sm:$0xff]  }
  0x48   :  { %1372 = vmatprep.subr.bf16.mxu0 %v1471_v8  ;;  %1404 = vmatprep.subr.bf16.mxu1 %v1471_v8 }
  0x4b   :  { %1373 = vmatpush3.bf16.msra.mxu0 %v1471_v8  ;;  %1405 = vmatpush3.bf16.msra.mxu1 %v1471_v8 }
  0x4c   :  { %1374 = vmatprep.subr.bf16.mxu0 %v1472_v9  ;;  %1406 = vmatprep.subr.bf16.mxu1 %v1472_v9 }
  0x4f   :  { %1375 = vmatpush3.bf16.msra.mxu0 %v1472_v9  ;;  %1407 = vmatpush3.bf16.msra.mxu1 %v1472_v9 }
  0x50   :  { %1280 = vmatprep.subr.bf16.mxu0 %v1489_v10  ;;  %1424 = vmatprep.subr.bf16.mxu1 %v1493_v13 }
  0x52   :  { %1377 = vmatmul.mubr.bf16.vlgmr.msra.gmra.mxu0 %v1474_v11  ;;  %1409 = vmatmul.mubr.bf16.vlgmr.msra.gmra.mxu1 %v1476_v12 }
  0x53   :  { %1380 = vmatprep.mubr.bf16.mxu0 %v1477_v14  ;;  %1412 = vmatprep.mubr.bf16.mxu1 %v1479_v15 }
  0x54   :  { %1281 = vmatpush3.bf16.msra.mxu0 %v1490_v16  ;;  %1425 = vmatpush3.bf16.msra.mxu1 %v1493_v13  ;;  %v1242_v16 = vld [vmem:[#allocation3 + $0x10] sm:$0xff]  }
  0x55   :  { %1282 = vmatprep.subr.bf16.mxu0 %v1491_v17  ;;  %1426 = vmatprep.subr.bf16.mxu1 %v1496_v18 }
  0x58   :  { %1283 = vmatpush3.bf16.msra.mxu0 %v1492_v19  ;;  %1427 = vmatpush3.bf16.msra.mxu1 %v1496_v18 }
  0x59   :  { %1284 = vmatprep.subr.bf16.mxu0 %v1494_v22  ;;  %1428 = vmatprep.subr.bf16.mxu1 %v1499_v25 }
  0x5a   :  { %1381 = vmatmul.mubr.bf16.gmra.mxu0 %v1478_v20  ;;  %1413 = vmatmul.mubr.bf16.gmra.mxu1 %v1480_v21 }
  0x5b   :  { %1384 = vmatprep.mubr.bf16.mxu0 %v1481_v23  ;;  %1416 = vmatprep.mubr.bf16.mxu1 %v1483_v24 }
  0x5c   :  { %1285 = vmatpush3.bf16.msra.mxu0 %v1495_v26  ;;  %1429 = vmatpush3.bf16.msra.mxu1 %v1499_v25 }
  0x5d   :  { %1286 = vmatprep.subr.bf16.mxu0 %v1497_v27  ;;  %1430 = vmatprep.subr.bf16.mxu1 %v1502_v28  ;;  %v1243_v27 = vld [vmem:[#allocation3 + $0x18] sm:$0xff]  }
  0x60   :  { %1287 = vmatpush3.bf16.msra.mxu0 %v1498_v29  ;;  %1431 = vmatpush3.bf16.msra.mxu1 %v1502_v28 }
  0x61   :  { %1288 = vmatprep.subr.bf16.mxu0 %v1500_v30  ;;  %1432 = vmatprep.subr.bf16.mxu1 %v1505_v31 }
  0x62   :  { %1385 = vmatmul.mubr.bf16.gmra.mxu0 %v1482_v32  ;;  %1417 = vmatmul.mubr.bf16.gmra.mxu1 %v1484_v33 }
  0x63   :  { %1388 = vmatprep.mubr.bf16.mxu0 %v1485_v34  ;;  %1420 = vmatprep.mubr.bf16.mxu1 %v1487_v35 }
  0x64   :  { %1289 = vmatpush3.bf16.msra.mxu0 %v1501_v36  ;;  %1433 = vmatpush3.bf16.msra.mxu1 %v1505_v31  ;;  %v1244_v31 = vld [vmem:[#allocation3 + $0x20] sm:$0xff]   ;;  %v1245_v36 = vld [vmem:[#allocation3 + $0x28] sm:$0xff]  }
  0x65   :  { %1290 = vmatprep.subr.bf16.mxu0 %v1503_v37  ;;  %1434 = vmatprep.subr.bf16.mxu1 %v1508_v42  ;;  %v1246_v37 = vld [vmem:[#allocation3 + $0x30] sm:$0xff]  }
  0x68   :  { %1291 = vmatpush3.bf16.msra.mxu0 %v1504_v38  ;;  %1435 = vmatpush3.bf16.msra.mxu1 %v1508_v42 }
  0x69   :  { %1292 = vmatprep.subr.bf16.mxu0 %v1506_v41  ;;  %1436 = vmatprep.subr.bf16.mxu1 %v1511_v45 }
  0x6a   :  { %1389 = vmatmul.mubr.bf16.gmra.mxu0 %v1486_v39  ;;  %1421 = vmatmul.mubr.bf16.gmra.mxu1 %v1488_v40  ;;  %v1247_v39 = vld [vmem:[#allocation3 + $0x38] sm:$0xff]  }
  0x6c   :  { %1293 = vmatpush3.bf16.msra.mxu0 %v1507_v43  ;;  %1437 = vmatpush3.bf16.msra.mxu1 %v1511_v45  ;;  %v1687_v43 = vld [vmem:[%s1712_s4] ss:$0 sm:$0xff]  ;;  %s1627_s4 = smov [#allocation11]  }
  0x6d   :  { %1294 = vmatprep.subr.bf16.mxu0 %v1509_v44  ;;  %1438 = vmatprep.subr.bf16.mxu1 %v1512_v47  ;;  %s1142_s13 = sshll.u32 %s1627_s4, 4  ;;  %s1143_s13 = int_to_ptr.vmem [resolvable:$true] %s1142_s13 }
  0x6e   :  { %s1593_s14 = scalar_lea.vmem %s1143_s13, 2048  ;;  %p1598_p7 = scmp.lt.s32.totalorder %s1143_s13, %s1143_s13 }
  0x6f   :  { %p1594_p6 = scmp.ne.s32.totalorder %s1143_s13, %s1593_s14  ;;  %p1599_p8 = scmp.lt.s32.totalorder %s1593_s14, %s1593_s14 }
  0x70   :  { %1295 = vmatpush3.bf16.msra.mxu0 %v1510_v46  ;;  %1439 = vmatpush3.bf16.msra.mxu1 %v1512_v47 }
  0x71   :  { %p1600_p9 = por %p1599_p8, %p1598_p7 }
  0x73   :  { %p1601_p10 = pnand %p1600_p9, %p1594_p6 }
 0x112   :  { %v1378_v48 = vpop.f32.mrf.mxu0  ;;  %v1410_v49 = vpop.f32.mrf.mxu1 }
 0x114   :  { %v349_v50 = vpop.f32.mrf.mxu0  ;;  %v558_v51 = vpop.f32.mrf.mxu1 }
 0x116   :  { %v1379_v52 = vpop.f32.mrf.mxu0  ;;  %v1411_v53 = vpop.f32.mrf.mxu1 }
 0x117   :  { %v709_v55 = vpack.c.bf16 %v1411_v53, %v1410_v49  ;;  %v708_v62 = vpack.c.bf16 %v1379_v52, %v1378_v48 }
 0x118   :  { %v352_v54 = vpop.f32.mrf.mxu0  ;;  %v561_v56 = vpop.f32.mrf.mxu1 }
 0x119   :  { %v705_v57 = vpack.c.bf16 %v352_v54, %v349_v50  ;;  %v706_v58 = vpack.c.bf16 %v561_v56, %v558_v51 }
 0x11a   :  { %v1382_v60 = vpop.f32.mrf.mxu0  ;;  %v1414_v61 = vpop.f32.mrf.mxu1 }
 0x11b   :  { %959 = vmatprep.mubr.bf16.mxu0 %v705_v57  ;;  %1440 = vmatprep.mubr.bf16.mxu1 %v706_v58 }
 0x11c   :  { %960 = vmatmul.mubr.bf16.vlgmr.msra.gmra.mxu0 %v1210_v59  ;;  %v365_v63 = vpop.f32.mrf.mxu0  ;;  %1441 = vmatmul.mubr.bf16.vlgmr.msra.gmra.mxu1 %v709_v55  ;;  %v574_v0 = vpop.f32.mrf.mxu1 }
 0x11d   :  { %967 = vmatprep.mubr.bf16.mxu0 %v708_v62 }
 0x11e   :  { %v1383_v1 = vpop.f32.mrf.mxu0  ;;  %v1415_v2 = vpop.f32.mrf.mxu1 }
 0x11f   :  { %v715_v4 = vpack.c.bf16 %v1415_v2, %v1414_v61  ;;  %v714_v20 = vpack.c.bf16 %v1383_v1, %v1382_v60 }
 0x120   :  { %v368_v3 = vpop.f32.mrf.mxu0  ;;  %v577_v5 = vpop.f32.mrf.mxu1 }
 0x121   :  { %v711_v6 = vpack.c.bf16 %v368_v3, %v365_v63  ;;  %v712_v8 = vpack.c.bf16 %v577_v5, %v574_v0 }
 0x122   :  { %v1386_v9 = vpop.f32.mrf.mxu0  ;;  %v1418_v10 = vpop.f32.mrf.mxu1 }
 0x123   :  { %1444 = vmatprep.mubr.bf16.mxu1 %v712_v8 }
 0x124   :  { %968 = vmatmul.mubr.bf16.gmra.mxu0 %v1241_v7  ;;  %1445 = vmatmul.mubr.bf16.gmra.mxu1 %v715_v4  ;;  %v590_v11 = vpop.f32.mrf.mxu1  ;;  %v381_v12 = vpop.f32.mrf.mxu0 }
 0x125   :  { %975 = vmatprep.mubr.bf16.mxu0 %v711_v6 }
 0x126   :  { %v1419_v13 = vpop.f32.mrf.mxu1  ;;  %v1387_v18 = vpop.f32.mrf.mxu0 }
 0x127   :  { %v721_v14 = vpack.c.bf16 %v1419_v13, %v1418_v10  ;;  %v720_v33 = vpack.c.bf16 %v1387_v18, %v1386_v9 }
 0x128   :  { %v593_v15 = vpop.f32.mrf.mxu1  ;;  %v384_v22 = vpop.f32.mrf.mxu0 }
 0x129   :  { %v718_v17 = vpack.c.bf16 %v593_v15, %v590_v11  ;;  %v717_v26 = vpack.c.bf16 %v384_v22, %v381_v12 }
 0x12a   :  { %v1422_v19 = vpop.f32.mrf.mxu1  ;;  %v1390_v29 = vpop.f32.mrf.mxu0 }
 0x12b   :  { %1448 = vmatprep.mubr.bf16.mxu1 %v718_v17 }
 0x12c   :  { %976 = vmatmul.mubr.bf16.gmra.mxu0 %v1242_v16  ;;  %1449 = vmatmul.mubr.bf16.gmra.mxu1 %v721_v14  ;;  %v606_v21 = vpop.f32.mrf.mxu1  ;;  %v397_v30 = vpop.f32.mrf.mxu0 }
 0x12d   :  { %983 = vmatprep.mubr.bf16.mxu0 %v714_v20 }
 0x12e   :  { %v1423_v23 = vpop.f32.mrf.mxu1  ;;  %v1391_v32 = vpop.f32.mrf.mxu0 }
 0x12f   :  { %v727_v24 = vpack.c.bf16 %v1423_v23, %v1422_v19  ;;  %v726_v38 = vpack.c.bf16 %v1391_v32, %v1390_v29 }
 0x130   :  { %v609_v25 = vpop.f32.mrf.mxu1  ;;  %v400_v34 = vpop.f32.mrf.mxu0 }
 0x131   :  { %v724_v28 = vpack.c.bf16 %v609_v25, %v606_v21  ;;  %v723_v35 = vpack.c.bf16 %v400_v34, %v397_v30 }
 0x133   :  { %1452 = vmatprep.mubr.bf16.mxu1 %v724_v28 }
 0x134   :  { %984 = vmatmul.mubr.bf16.gmra.mxu0 %v1243_v27  ;;  %1453 = vmatmul.mubr.bf16.gmra.mxu1 %v727_v24 }
 0x135   :  { %991 = vmatprep.mubr.bf16.mxu0 %v717_v26 }
 0x13c   :  { %992 = vmatmul.mubr.bf16.gmra.mxu0 %v1244_v31 }
 0x13d   :  { %999 = vmatprep.mubr.bf16.mxu0 %v720_v33 }
 0x144   :  { %1000 = vmatmul.mubr.bf16.gmra.mxu0 %v1245_v36 }
 0x145   :  { %1007 = vmatprep.mubr.bf16.mxu0 %v723_v35 }
 0x14c   :  { %1008 = vmatmul.mubr.bf16.gmra.mxu0 %v1246_v37 }
 0x14d   :  { %1015 = vmatprep.mubr.bf16.mxu0 %v726_v38 }
 0x154   :  { %1016 = vmatmul.mubr.bf16.gmra.mxu0 %v1247_v39 }
 0x1dc   :  { %v1296_v40 = vpop.f32.mrf.mxu0  ;;  %v1442_v41 = vpop.f32.mrf.mxu1 }
 0x1de   :  { %v1297_v42 = vpop.f32.mrf.mxu0  ;;  %v1058_v44 = vpop.f32.mrf.mxu1 }
 0x1df   :  { %v1298_v45 = vadd.f32 %v1297_v42, %v1296_v40 }
 0x1e0   :  { %v1299_v46 = vpop.f32.mrf.mxu0  ;;  %v1443_v47 = vpop.f32.mrf.mxu1 }
 0x1e1   :  { %v962_v48 = vadd.f32 %v1298_v45, %v1687_v43 }
 0x1e2   :  { %v1300_v49 = vpop.f32.mrf.mxu0  ;;  %v1061_v53 = vpop.f32.mrf.mxu1 }
 0x1e3   :  { %v1301_v50 = vadd.f32 %v1300_v49, %v1299_v46  ;;  %v1059_v51 = vadd.f32 %v1058_v44, %v962_v48 }
 0x1e4   :  { %v1302_v52 = vpop.f32.mrf.mxu0  ;;  %v1446_v59 = vpop.f32.mrf.mxu1 }
 0x1e5   :  { %1121 = vst [vmem:[#allocation11] sm:$0xff] %v1059_v51  ;;  %v965_v54 = vadd.f32 %v1301_v50, %v1687_v43 }
 0x1e6   :  { %v1303_v55 = vpop.f32.mrf.mxu0  ;;  %v1074_v1 = vpop.f32.mrf.mxu1 }
 0x1e7   :  { %v1304_v56 = vadd.f32 %v1303_v55, %v1302_v52  ;;  %v1062_v57 = vadd.f32 %v1061_v53, %v965_v54 }
 0x1e8   :  { %v1305_v58 = vpop.f32.mrf.mxu0  ;;  %v1447_v7 = vpop.f32.mrf.mxu1 }
 0x1e9   :  { %v970_v60 = vadd.f32 %v1304_v56, %v1687_v43  ;;  %1122 = vst [vmem:[#allocation11 + $0x8] sm:$0xff] %v1062_v57 }
 0x1ea   :  { %v1306_v61 = vpop.f32.mrf.mxu0  ;;  %v1077_v13 = vpop.f32.mrf.mxu1 }
 0x1eb   :  { %v1067_v62 = vadd.f32 %v1442_v41, %v970_v60  ;;  %v1307_v63 = vadd.f32 %v1306_v61, %v1305_v58 }
 0x1ec   :  { %v1308_v0 = vpop.f32.mrf.mxu0  ;;  %v1450_v19 = vpop.f32.mrf.mxu1 }
 0x1ed   :  { %1123 = vst [vmem:[#allocation11 + $0x10] sm:$0xff] %v1067_v62  ;;  %v973_v2 = vadd.f32 %v1307_v63, %v1687_v43 }
 0x1ee   :  { %v1309_v3 = vpop.f32.mrf.mxu0  ;;  %v1090_v25 = vpop.f32.mrf.mxu1 }
 0x1ef   :  { %v1070_v4 = vadd.f32 %v1443_v47, %v973_v2  ;;  %v1310_v5 = vadd.f32 %v1309_v3, %v1308_v0 }
 0x1f0   :  { %v1311_v6 = vpop.f32.mrf.mxu0  ;;  %v1451_v31 = vpop.f32.mrf.mxu1 }
 0x1f1   :  { %1124 = vst [vmem:[#allocation11 + $0x18] sm:$0xff] %v1070_v4  ;;  %v978_v8 = vadd.f32 %v1310_v5, %v1687_v43 }
 0x1f2   :  { %v1312_v9 = vpop.f32.mrf.mxu0  ;;  %v1093_v37 = vpop.f32.mrf.mxu1 }
 0x1f3   :  { %v1313_v10 = vadd.f32 %v1312_v9, %v1311_v6  ;;  %v1075_v11 = vadd.f32 %v1074_v1, %v978_v8 }
 0x1f4   :  { %v1314_v12 = vpop.f32.mrf.mxu0  ;;  %v1454_v46 = vpop.f32.mrf.mxu1 }
 0x1f5   :  { %1125 = vst [vmem:[#allocation11 + $0x20] sm:$0xff] %v1075_v11  ;;  %v981_v14 = vadd.f32 %v1313_v10, %v1687_v43 }
 0x1f6   :  { %v1315_v15 = vpop.f32.mrf.mxu0  ;;  %v1106_v51 = vpop.f32.mrf.mxu1 }
 0x1f7   :  { %v1316_v16 = vadd.f32 %v1315_v15, %v1314_v12  ;;  %v1078_v17 = vadd.f32 %v1077_v13, %v981_v14 }
 0x1f8   :  { %v1317_v18 = vpop.f32.mrf.mxu0  ;;  %v1455_v57 = vpop.f32.mrf.mxu1 }
 0x1f9   :  { %v986_v20 = vadd.f32 %v1316_v16, %v1687_v43  ;;  %1126 = vst [vmem:[#allocation11 + $0x28] sm:$0xff] %v1078_v17 }
 0x1fa   :  { %v1318_v21 = vpop.f32.mrf.mxu0  ;;  %v1109_v63 = vpop.f32.mrf.mxu1 }
 0x1fb   :  { %v1083_v22 = vadd.f32 %v1446_v59, %v986_v20  ;;  %v1319_v23 = vadd.f32 %v1318_v21, %v1317_v18 }
 0x1fc   :  { %v1320_v24 = vpop.f32.mrf.mxu0 }
 0x1fd   :  { %1127 = vst [vmem:[#allocation11 + $0x30] sm:$0xff] %v1083_v22  ;;  %v989_v26 = vadd.f32 %v1319_v23, %v1687_v43 }
 0x1fe   :  { %v1321_v27 = vpop.f32.mrf.mxu0 }
 0x1ff   :  { %v1086_v28 = vadd.f32 %v1447_v7, %v989_v26  ;;  %v1322_v29 = vadd.f32 %v1321_v27, %v1320_v24 }
 0x200   :  { %v1323_v30 = vpop.f32.mrf.mxu0 }
 0x201   :  { %1128 = vst [vmem:[#allocation11 + $0x38] sm:$0xff] %v1086_v28  ;;  %v994_v32 = vadd.f32 %v1322_v29, %v1687_v43 }
 0x202   :  { %v1324_v33 = vpop.f32.mrf.mxu0 }
 0x203   :  { %v1325_v34 = vadd.f32 %v1324_v33, %v1323_v30  ;;  %v1091_v35 = vadd.f32 %v1090_v25, %v994_v32 }
 0x204   :  { %v1326_v36 = vpop.f32.mrf.mxu0 }
 0x205   :  { %1129 = vst [vmem:[#allocation11 + $0x40] sm:$0xff] %v1091_v35  ;;  %v997_v38 = vadd.f32 %v1325_v34, %v1687_v43 }
 0x206   :  { %v1327_v39 = vpop.f32.mrf.mxu0 }
 0x207   :  { %v1328_v40 = vadd.f32 %v1327_v39, %v1326_v36  ;;  %v1094_v41 = vadd.f32 %v1093_v37, %v997_v38 }
 0x208   :  { %v1329_v42 = vpop.f32.mrf.mxu0 }
 0x209   :  { %v1002_v44 = vadd.f32 %v1328_v40, %v1687_v43  ;;  %1130 = vst [vmem:[#allocation11 + $0x48] sm:$0xff] %v1094_v41 }
 0x20a   :  { %v1330_v45 = vpop.f32.mrf.mxu0 }
 0x20b   :  { %v1099_v47 = vadd.f32 %v1450_v19, %v1002_v44  ;;  %v1331_v48 = vadd.f32 %v1330_v45, %v1329_v42 }
 0x20c   :  { %v1332_v49 = vpop.f32.mrf.mxu0 }
 0x20d   :  { %1131 = vst [vmem:[#allocation11 + $0x50] sm:$0xff] %v1099_v47  ;;  %v1005_v50 = vadd.f32 %v1331_v48, %v1687_v43 }
 0x20e   :  { %v1333_v52 = vpop.f32.mrf.mxu0 }
 0x20f   :  { %v1102_v53 = vadd.f32 %v1451_v31, %v1005_v50  ;;  %v1334_v54 = vadd.f32 %v1333_v52, %v1332_v49 }
 0x210   :  { %v1335_v55 = vpop.f32.mrf.mxu0 }
 0x211   :  { %1132 = vst [vmem:[#allocation11 + $0x58] sm:$0xff] %v1102_v53  ;;  %v1010_v56 = vadd.f32 %v1334_v54, %v1687_v43 }
 0x212   :  { %v1336_v58 = vpop.f32.mrf.mxu0 }
 0x213   :  { %v1107_v59 = vadd.f32 %v1106_v51, %v1010_v56  ;;  %v1337_v60 = vadd.f32 %v1336_v58, %v1335_v55 }
 0x214   :  { %v1338_v61 = vpop.f32.mrf.mxu0 }
 0x215   :  { %1133 = vst [vmem:[#allocation11 + $0x60] sm:$0xff] %v1107_v59  ;;  %v1013_v62 = vadd.f32 %v1337_v60, %v1687_v43 }
 0x216   :  { %v1339_v0 = vpop.f32.mrf.mxu0 }
 0x217   :  { %v1110_v1 = vadd.f32 %v1109_v63, %v1013_v62  ;;  %v1340_v2 = vadd.f32 %v1339_v0, %v1338_v61 }
 0x218   :  { %v1341_v3 = vpop.f32.mrf.mxu0 }
 0x219   :  { %1134 = vst [vmem:[#allocation11 + $0x68] sm:$0xff] %v1110_v1  ;;  %v1018_v4 = vadd.f32 %v1340_v2, %v1687_v43 }
 0x21a   :  { %v1342_v5 = vpop.f32.mrf.mxu0 }
 0x21b   :  { %v1115_v6 = vadd.f32 %v1454_v46, %v1018_v4  ;;  %v1343_v7 = vadd.f32 %v1342_v5, %v1341_v3 }
 0x21d   :  { %1135 = vst [vmem:[#allocation11 + $0x70] sm:$0xff] %v1115_v6  ;;  %v1021_v8 = vadd.f32 %v1343_v7, %v1687_v43 }
 0x21f   :  { %v1118_v9 = vadd.f32 %v1455_v57, %v1021_v8 }
 0x221   :  { %1136 = vst [vmem:[#allocation11 + $0x78] sm:$0xff] %v1118_v9 }
 0x222   :  { %1604 = shalt.err (!%p1601_p10)
}
 0x223   :  { %s1628_s15 = smov 128   ;;  %s1629_s16 = smov 8  }
 0x224   :  { %1148 = dma.vmem_to_hbm [thread:$0]  %s1143_s13, 2048, %s1713_s5, [#allocation5], %s1628_s15, %s1628_s15, %s1629_s16  }
 0x225   :  { %1619 = dma.done.wait [#allocation5], 2048  }
 0x226   :  { %1620 = vsyncadd [#allocation5], 4294965248 }
 0x227   :  { %1152 = vsyncpa [#allocation4], 1 }
 0x228   :  { %1153 = vsyncpa [#allocation7], 1 }
 0x229   :  { %1154 = vsyncpa [#allocation10], 1 }
 0x22a   :  { %1155 = vsyncpa [#allocation5], 1 }

// kernel: tpu_custom_call.1
= control target key start
LH: loop header
LB: loop body
LE: loop exit
PB: predicated region body
PF: predicated region fallthrough
CT: control target
= control target key end

     0   :  { %10 = vsyncpa [#allocation4], 0  ;;  %s1708_s0 = inlined_call_operand.hbm [shape: bf16[128,128], index: 0, kind: input, shape index: {}]   ;;  %s1709_s1 = inlined_call_operand.hbm [shape: bf16[128,128], index: 1, kind: input, shape index: {}]   ;;  %s1710_s2 = inlined_call_operand.hbm [shape: bf16[128,128], index: 2, kind: input, shape index: {}]   ;;  %s1711_s3 = inlined_call_operand.hbm [shape: bf16[384,128], index: 3, kind: input, shape index: {}]   ;;  %s1712_s4 = inlined_call_operand.vmem [shape: f32[1,128], index: 4, kind: input, shape index: {}]   ;;  %s1713_s5 = inlined_call_operand.hbm [shape: f32[128,128], index: 5, kind: output, shape index: {}]  }
   0x1   :  { %11 = vsyncpa [#allocation7], 0 }
   0x2   :  { %12 = vsyncpa [#allocation10], 0 }
   0x3   :  { %13 = vsyncpa [#allocation5], 0  ;;  %s1621_s18 = smov [#allocation6]   ;;  %s1622_s20 = smov [#allocation3]  }
   0x4   :  { %s31_s19 = sshll.u32 %s1621_s18, 4  ;;  %s19_s21 = sshll.u32 %s1622_s20, 4  ;;  %s32_s19 = int_to_ptr.vmem [resolvable:$true] %s31_s19  ;;  %s20_s21 = int_to_ptr.vmem [resolvable:$true] %s19_s21 }
   0x5   :  { %s1521_s22 = scalar_lea.vmem %s32_s19, 1024  ;;  %p1526_p1 = scmp.lt.s32.totalorder %s32_s19, %s32_s19 }
   0x6   :  { %p1522_p0 = scmp.ne.s32.totalorder %s32_s19, %s1521_s22  ;;  %p1527_p2 = scmp.lt.s32.totalorder %s1521_s22, %s1521_s22 }
   0x8   :  { %p1528_p3 = por %p1527_p2, %p1526_p1 }
   0xa   :  { %p1529_p4 = pnand %p1528_p3, %p1522_p0 }
   0xc   :  { %1532 = shalt.err (!%p1529_p4)
}
   0xd   :  { %s1623_s23 = smov 64   ;;  %s1624_s24 = smov 4  }
   0xe   :  { %37 = dma.hbm_to_vmem [thread:$0]  %s1709_s1, 1024, %s32_s19, [#allocation7], %s1623_s23, %s1623_s23, %s1624_s24  }
   0xf   :  { %s1541_s27 = scalar_lea.vmem %s20_s21, 1024  ;;  %p1546_p6 = scmp.lt.s32.totalorder %s20_s21, %s20_s21 }
  0x10   :  { %p1542_p5 = scmp.ne.s32.totalorder %s20_s21, %s1541_s27  ;;  %p1547_p7 = scmp.lt.s32.totalorder %s1541_s27, %s1541_s27 }
  0x12   :  { %p1548_p8 = por %p1547_p7, %p1546_p6 }
  0x14   :  { %p1549_p9 = pnand %p1548_p8, %p1542_p5 }
  0x16   :  { %1552 = shalt.err (!%p1549_p9)
}
  0x17   :  { %25 = dma.hbm_to_vmem [thread:$0]  %s1708_s0, 1024, %s20_s21, [#allocation4], %s1623_s23, %s1623_s23, %s1624_s24  }
  0x18   :  { %s1625_s30 = smov [#allocation8]   ;;  %s1626_s7 = smov [#allocation9]  }
  0x19   :  { %s43_s6 = sshll.u32 %s1625_s30, 4  ;;  %s55_s8 = sshll.u32 %s1626_s7, 4  ;;  %s44_s6 = int_to_ptr.vmem [resolvable:$true] %s43_s6  ;;  %s56_s8 = int_to_ptr.vmem [resolvable:$true] %s55_s8 }
  0x1a   :  { %s1561_s1 = scalar_lea.vmem %s44_s6, 1024  ;;  %p1566_p11 = scmp.lt.s32.totalorder %s44_s6, %s44_s6 }
  0x1b   :  { %p1562_p10 = scmp.ne.s32.totalorder %s44_s6, %s1561_s1  ;;  %p1567_p12 = scmp.lt.s32.totalorder %s1561_s1, %s1561_s1 }
  0x1d   :  { %p1568_p13 = por %p1567_p12, %p1566_p11 }
  0x1f   :  { %p1569_p0 = pnand %p1568_p13, %p1562_p10 }
  0x21   :  { %1572 = shalt.err (!%p1569_p0)
}
  0x22   :  { %49 = dma.hbm_to_vmem [thread:$0]  %s1710_s2, 1024, %s44_s6, [#allocation7], %s1623_s23, %s1623_s23, %s1624_s24  }
  0x23   :  { %s1581_s0 = scalar_lea.vmem %s56_s8, 3072  ;;  %p1586_p2 = scmp.lt.s32.totalorder %s56_s8, %s56_s8 }
  0x24   :  { %p1582_p1 = scmp.ne.s32.totalorder %s56_s8, %s1581_s0  ;;  %p1587_p3 = scmp.lt.s32.totalorder %s1581_s0, %s1581_s0 }
  0x26   :  { %p1588_p4 = por %p1587_p3, %p1586_p2 }
  0x28   :  { %p1589_p5 = pnand %p1588_p4, %p1582_p1 }
  0x2a   :  { %1592 = shalt.err (!%p1589_p5)
}
  0x2b   :  { %61 = dma.hbm_to_vmem [thread:$0]  %s1711_s3, 3072, %s56_s8, [#allocation10], %s1623_s23, %s1623_s23, %s1624_s24  }
  0x2c   :  { %1613 = dma.done.wait [#allocation4], 1024  }
  0x2d   :  { %1614 = vsyncadd [#allocation4], 4294966272 }
  0x2e   :  { %1615 = dma.done.wait [#allocation7], 2048  }
  0x2f   :  { %1616 = vsyncadd [#allocation7], 4294965248 }
  0x30   :  { %1617 = dma.done.wait [#allocation10], 3072  }
  0x31   :  { %1618 = vsyncadd [#allocation10], 4294964224  ;;  %v1465_v0 = vld [vmem:[#allocation3 + $0x38] sm:$0xff]   ;;  %v1466_v1 = vld [vmem:[#allocation3 + $0x30] sm:$0xff]  }
  0x32   :  { %1360 = vmatprep.subr.bf16.mxu0 %v1465_v0  ;;  %1392 = vmatprep.subr.bf16.mxu1 %v1465_v0  ;;  %v1467_v2 = vld [vmem:[#allocation3 + $0x28] sm:$0xff]   ;;  %v1468_v3 = vld [vmem:[#allocation3 + $0x20] sm:$0xff]   ;;  %v1469_v6 = vld [vmem:[#allocation3 + $0x18] sm:$0xff]  }
  0x33   :  { %1361 = vmatpush3.bf16.msra.mxu0 %v1465_v0  ;;  %1393 = vmatpush3.bf16.msra.mxu1 %v1465_v0  ;;  %v1473_v4 = vld [vmem:[#allocation6] sm:$0xff]   ;;  %v1470_v7 = vld [vmem:[#allocation3 + $0x10] sm:$0xff]   ;;  %v1471_v8 = vld [vmem:[#allocation3 + $0x8] sm:$0xff]  }
  0x34   :  { %1362 = vmatprep.subr.bf16.mxu0 %v1466_v1  ;;  %1394 = vmatprep.subr.bf16.mxu1 %v1466_v1  ;;  %v1475_v5 = vld [vmem:[#allocation8] sm:$0xff]   ;;  %v1489_v10 = vld [vmem:[#allocation9 + $0x78] sm:$0xff]   ;;  %v1474_v11 = vld [vmem:[#allocation6 + $0x8] sm:$0xff]  }
  0x35   :  { %1376 = vmatprep.mubr.bf16.mxu0 %v1473_v4  ;;  %1408 = vmatprep.mubr.bf16.mxu1 %v1475_v5  ;;  %v1472_v9 = vld [vmem:[#allocation3] sm:$0xff]   ;;  %v1476_v12 = vld [vmem:[#allocation8 + $0x8] sm:$0xff]   ;;  %v1493_v13 = vld [vmem:[#allocation9 + $0xb8] sm:$0xff]  }
  0x36   :  { %v1477_v14 = vld [vmem:[#allocation6 + $0x10] sm:$0xff]   ;;  %v1490_v16 = vld [vmem:[#allocation9 + $0x38] sm:$0xff]   ;;  %v1494_v22 = vld [vmem:[#allocation9 + $0x68] sm:$0xff]  }
  0x37   :  { %1363 = vmatpush3.bf16.msra.mxu0 %v1466_v1  ;;  %1395 = vmatpush3.bf16.msra.mxu1 %v1466_v1  ;;  %v1479_v15 = vld [vmem:[#allocation8 + $0x10] sm:$0xff]   ;;  %v1478_v20 = vld [vmem:[#allocation6 + $0x18] sm:$0xff]   ;;  %v1481_v23 = vld [vmem:[#allocation6 + $0x20] sm:$0xff]  }
  0x38   :  { %1364 = vmatprep.subr.bf16.mxu0 %v1467_v2  ;;  %1396 = vmatprep.subr.bf16.mxu1 %v1467_v2  ;;  %v1491_v17 = vld [vmem:[#allocation9 + $0x70] sm:$0xff]   ;;  %v1480_v21 = vld [vmem:[#allocation8 + $0x18] sm:$0xff]   ;;  %v1483_v24 = vld [vmem:[#allocation8 + $0x20] sm:$0xff]  }
  0x39   :  { %v1496_v18 = vld [vmem:[#allocation9 + $0xb0] sm:$0xff]   ;;  %v1499_v25 = vld [vmem:[#allocation9 + $0xa8] sm:$0xff]   ;;  %v1497_v27 = vld [vmem:[#allocation9 + $0x60] sm:$0xff]  }
  0x3a   :  { %v1492_v19 = vld [vmem:[#allocation9 + $0x30] sm:$0xff]   ;;  %v1495_v26 = vld [vmem:[#allocation9 + $0x28] sm:$0xff]   ;;  %v1502_v28 = vld [vmem:[#allocation9 + $0xa0] sm:$0xff]  }
  0x3b   :  { %1365 = vmatpush3.bf16.msra.mxu0 %v1467_v2  ;;  %1397 = vmatpush3.bf16.msra.mxu1 %v1467_v2  ;;  %v1498_v29 = vld [vmem:[#allocation9 + $0x20] sm:$0xff]   ;;  %v1500_v30 = vld [vmem:[#allocation9 + $0x58] sm:$0xff]   ;;  %v1482_v32 = vld [vmem:[#allocation6 + $0x28] sm:$0xff]  }
  0x3c   :  { %1366 = vmatprep.subr.bf16.mxu0 %v1468_v3  ;;  %1398 = vmatprep.subr.bf16.mxu1 %v1468_v3  ;;  %v1505_v31 = vld [vmem:[#allocation9 + $0x98] sm:$0xff]   ;;  %v1484_v33 = vld [vmem:[#allocation8 + $0x28] sm:$0xff]   ;;  %v1485_v34 = vld [vmem:[#allocation6 + $0x30] sm:$0xff]  }
  0x3d   :  { %v1487_v35 = vld [vmem:[#allocation8 + $0x30] sm:$0xff]   ;;  %v1501_v36 = vld [vmem:[#allocation9 + $0x18] sm:$0xff]   ;;  %v1506_v41 = vld [vmem:[#allocation9 + $0x48] sm:$0xff]  }
  0x3e   :  { %v1503_v37 = vld [vmem:[#allocation9 + $0x50] sm:$0xff]   ;;  %v1486_v39 = vld [vmem:[#allocation6 + $0x38] sm:$0xff]   ;;  %v1507_v43 = vld [vmem:[#allocation9 + $0x8] sm:$0xff]  }
  0x3f   :  { %1367 = vmatpush3.bf16.msra.mxu0 %v1468_v3  ;;  %1399 = vmatpush3.bf16.msra.mxu1 %v1468_v3  ;;  %v1504_v38 = vld [vmem:[#allocation9 + $0x10] sm:$0xff]   ;;  %v1488_v40 = vld [vmem:[#allocation8 + $0x38] sm:$0xff]   ;;  %v1509_v44 = vld [vmem:[#allocation9 + $0x40] sm:$0xff]  }
  0x40   :  { %1368 = vmatprep.subr.bf16.mxu0 %v1469_v6  ;;  %1400 = vmatprep.subr.bf16.mxu1 %v1469_v6  ;;  %v1508_v42 = vld [vmem:[#allocation9 + $0x90] sm:$0xff]   ;;  %v1511_v45 = vld [vmem:[#allocation9 + $0x88] sm:$0xff]   ;;  %v1510_v46 = vld [vmem:[#allocation9] sm:$0xff]  }
  0x41   :  { %v1512_v47 = vld [vmem:[#allocation9 + $0x80] sm:$0xff]  }
  0x42   :  { %v1210_v59 = vld [vmem:[#allocation3] sm:$0xff]  }
  0x43   :  { %1369 = vmatpush3.bf16.msra.mxu0 %v1469_v6  ;;  %1401 = vmatpush3.bf16.msra.mxu1 %v1469_v6 }
  0x44   :  { %1370 = vmatprep.subr.bf16.mxu0 %v1470_v7  ;;  %1402 = vmatprep.subr.bf16.mxu1 %v1470_v7 }
  0x47   :  { %1371 = vmatpush3.bf16.msra.mxu0 %v1470_v7  ;;  %1403 = vmatpush3.bf16.msra.mxu1 %v1470_v7  ;;  %v1241_v7 = vld [vmem:[#allocation3 + $0x8] sm:$0xff]  }
  0x48   :  { %1372 = vmatprep.subr.bf16.mxu0 %v1471_v8  ;;  %1404 = vmatprep.subr.bf16.mxu1 %v1471_v8 }
  0x4b   :  { %1373 = vmatpush3.bf16.msra.mxu0 %v1471_v8  ;;  %1405 = vmatpush3.bf16.msra.mxu1 %v1471_v8 }
  0x4c   :  { %1374 = vmatprep.subr.bf16.mxu0 %v1472_v9  ;;  %1406 = vmatprep.subr.bf16.mxu1 %v1472_v9 }
  0x4f   :  { %1375 = vmatpush3.bf16.msra.mxu0 %v1472_v9  ;;  %1407 = vmatpush3.bf16.msra.mxu1 %v1472_v9 }
  0x50   :  { %1280 = vmatprep.subr.bf16.mxu0 %v1489_v10  ;;  %1424 = vmatprep.subr.bf16.mxu1 %v1493_v13 }
  0x52   :  { %1377 = vmatmul.mubr.bf16.vlgmr.msra.gmra.mxu0 %v1474_v11  ;;  %1409 = vmatmul.mubr.bf16.vlgmr.msra.gmra.mxu1 %v1476_v12 }
  0x53   :  { %1380 = vmatprep.mubr.bf16.mxu0 %v1477_v14  ;;  %1412 = vmatprep.mubr.bf16.mxu1 %v1479_v15 }
  0x54   :  { %1281 = vmatpush3.bf16.msra.mxu0 %v1490_v16  ;;  %1425 = vmatpush3.bf16.msra.mxu1 %v1493_v13  ;;  %v1242_v16 = vld [vmem:[#allocation3 + $0x10] sm:$0xff]  }
  0x55   :  { %1282 = vmatprep.subr.bf16.mxu0 %v1491_v17  ;;  %1426 = vmatprep.subr.bf16.mxu1 %v1496_v18 }
  0x58   :  { %1283 = vmatpush3.bf16.msra.mxu0 %v1492_v19  ;;  %1427 = vmatpush3.bf16.msra.mxu1 %v1496_v18 }
  0x59   :  { %1284 = vmatprep.subr.bf16.mxu0 %v1494_v22  ;;  %1428 = vmatprep.subr.bf16.mxu1 %v1499_v25 }
  0x5a   :  { %1381 = vmatmul.mubr.bf16.gmra.mxu0 %v1478_v20  ;;  %1413 = vmatmul.mubr.bf16.gmra.mxu1 %v1480_v21 }
  0x5b   :  { %1384 = vmatprep.mubr.bf16.mxu0 %v1481_v23  ;;  %1416 = vmatprep.mubr.bf16.mxu1 %v1483_v24 }
  0x5c   :  { %1285 = vmatpush3.bf16.msra.mxu0 %v1495_v26  ;;  %1429 = vmatpush3.bf16.msra.mxu1 %v1499_v25 }
  0x5d   :  { %1286 = vmatprep.subr.bf16.mxu0 %v1497_v27  ;;  %1430 = vmatprep.subr.bf16.mxu1 %v1502_v28  ;;  %v1243_v27 = vld [vmem:[#allocation3 + $0x18] sm:$0xff]  }
  0x60   :  { %1287 = vmatpush3.bf16.msra.mxu0 %v1498_v29  ;;  %1431 = vmatpush3.bf16.msra.mxu1 %v1502_v28 }
  0x61   :  { %1288 = vmatprep.subr.bf16.mxu0 %v1500_v30  ;;  %1432 = vmatprep.subr.bf16.mxu1 %v1505_v31 }
  0x62   :  { %1385 = vmatmul.mubr.bf16.gmra.mxu0 %v1482_v32  ;;  %1417 = vmatmul.mubr.bf16.gmra.mxu1 %v1484_v33 }
  0x63   :  { %1388 = vmatprep.mubr.bf16.mxu0 %v1485_v34  ;;  %1420 = vmatprep.mubr.bf16.mxu1 %v1487_v35 }
  0x64   :  { %1289 = vmatpush3.bf16.msra.mxu0 %v1501_v36  ;;  %1433 = vmatpush3.bf16.msra.mxu1 %v1505_v31  ;;  %v1244_v31 = vld [vmem:[#allocation3 + $0x20] sm:$0xff]   ;;  %v1245_v36 = vld [vmem:[#allocation3 + $0x28] sm:$0xff]  }
  0x65   :  { %1290 = vmatprep.subr.bf16.mxu0 %v1503_v37  ;;  %1434 = vmatprep.subr.bf16.mxu1 %v1508_v42  ;;  %v1246_v37 = vld [vmem:[#allocation3 + $0x30] sm:$0xff]  }
  0x68   :  { %1291 = vmatpush3.bf16.msra.mxu0 %v1504_v38  ;;  %1435 = vmatpush3.bf16.msra.mxu1 %v1508_v42 }
  0x69   :  { %1292 = vmatprep.subr.bf16.mxu0 %v1506_v41  ;;  %1436 = vmatprep.subr.bf16.mxu1 %v1511_v45 }
  0x6a   :  { %1389 = vmatmul.mubr.bf16.gmra.mxu0 %v1486_v39  ;;  %1421 = vmatmul.mubr.bf16.gmra.mxu1 %v1488_v40  ;;  %v1247_v39 = vld [vmem:[#allocation3 + $0x38] sm:$0xff]  }
  0x6c   :  { %1293 = vmatpush3.bf16.msra.mxu0 %v1507_v43  ;;  %1437 = vmatpush3.bf16.msra.mxu1 %v1511_v45  ;;  %v1687_v43 = vld [vmem:[%s1712_s4] ss:$0 sm:$0xff]  ;;  %s1627_s4 = smov [#allocation11]  }
  0x6d   :  { %1294 = vmatprep.subr.bf16.mxu0 %v1509_v44  ;;  %1438 = vmatprep.subr.bf16.mxu1 %v1512_v47  ;;  %s1142_s13 = sshll.u32 %s1627_s4, 4  ;;  %s1143_s13 = int_to_ptr.vmem [resolvable:$true] %s1142_s13 }
  0x6e   :  { %s1593_s14 = scalar_lea.vmem %s1143_s13, 2048  ;;  %p1598_p7 = scmp.lt.s32.totalorder %s1143_s13, %s1143_s13 }
  0x6f   :  { %p1594_p6 = scmp.ne.s32.totalorder %s1143_s13, %s1593_s14  ;;  %p1599_p8 = scmp.lt.s32.totalorder %s1593_s14, %s1593_s14 }
  0x70   :  { %1295 = vmatpush3.bf16.msra.mxu0 %v1510_v46  ;;  %1439 = vmatpush3.bf16.msra.mxu1 %v1512_v47 }
  0x71   :  { %p1600_p9 = por %p1599_p8, %p1598_p7 }
  0x73   :  { %p1601_p10 = pnand %p1600_p9, %p1594_p6 }
 0x112   :  { %v1378_v48 = vpop.f32.mrf.mxu0  ;;  %v1410_v49 = vpop.f32.mrf.mxu1 }
 0x114   :  { %v349_v50 = vpop.f32.mrf.mxu0  ;;  %v558_v51 = vpop.f32.mrf.mxu1 }
 0x116   :  { %v1379_v52 = vpop.f32.mrf.mxu0  ;;  %v1411_v53 = vpop.f32.mrf.mxu1 }
 0x117   :  { %v709_v55 = vpack.c.bf16 %v1411_v53, %v1410_v49  ;;  %v708_v62 = vpack.c.bf16 %v1379_v52, %v1378_v48 }
 0x118   :  { %v352_v54 = vpop.f32.mrf.mxu0  ;;  %v561_v56 = vpop.f32.mrf.mxu1 }
 0x119   :  { %v705_v57 = vpack.c.bf16 %v352_v54, %v349_v50  ;;  %v706_v58 = vpack.c.bf16 %v561_v56, %v558_v51 }
 0x11a   :  { %v1382_v60 = vpop.f32.mrf.mxu0  ;;  %v1414_v61 = vpop.f32.mrf.mxu1 }
 0x11b   :  { %959 = vmatprep.mubr.bf16.mxu0 %v705_v57  ;;  %1440 = vmatprep.mubr.bf16.mxu1 %v706_v58 }
 0x11c   :  { %960 = vmatmul.mubr.bf16.vlgmr.msra.gmra.mxu0 %v1210_v59  ;;  %v365_v63 = vpop.f32.mrf.mxu0  ;;  %1441 = vmatmul.mubr.bf16.vlgmr.msra.gmra.mxu1 %v709_v55  ;;  %v574_v0 = vpop.f32.mrf.mxu1 }
 0x11d   :  { %967 = vmatprep.mubr.bf16.mxu0 %v708_v62 }
 0x11e   :  { %v1383_v1 = vpop.f32.mrf.mxu0  ;;  %v1415_v2 = vpop.f32.mrf.mxu1 }
 0x11f   :  { %v715_v4 = vpack.c.bf16 %v1415_v2, %v1414_v61  ;;  %v714_v20 = vpack.c.bf16 %v1383_v1, %v1382_v60 }
 0x120   :  { %v368_v3 = vpop.f32.mrf.mxu0  ;;  %v577_v5 = vpop.f32.mrf.mxu1 }
 0x121   :  { %v711_v6 = vpack.c.bf16 %v368_v3, %v365_v63  ;;  %v712_v8 = vpack.c.bf16 %v577_v5, %v574_v0 }
 0x122   :  { %v1386_v9 = vpop.f32.mrf.mxu0  ;;  %v1418_v10 = vpop.f32.mrf.mxu1 }
 0x123   :  { %1444 = vmatprep.mubr.bf16.mxu1 %v712_v8 }
 0x124   :  { %968 = vmatmul.mubr.bf16.gmra.mxu0 %v1241_v7  ;;  %1445 = vmatmul.mubr.bf16.gmra.mxu1 %v715_v4  ;;  %v590_v11 = vpop.f32.mrf.mxu1  ;;  %v381_v12 = vpop.f32.mrf.mxu0 }
 0x125   :  { %975 = vmatprep.mubr.bf16.mxu0 %v711_v6 }
 0x126   :  { %v1419_v13 = vpop.f32.mrf.mxu1  ;;  %v1387_v18 = vpop.f32.mrf.mxu0 }
 0x127   :  { %v721_v14 = vpack.c.bf16 %v1419_v13, %v1418_v10  ;;  %v720_v33 = vpack.c.bf16 %v1387_v18, %v1386_v9 }
 0x128   :  { %v593_v15 = vpop.f32.mrf.mxu1  ;;  %v384_v22 = vpop.f32.mrf.mxu0 }
 0x129   :  { %v718_v17 = vpack.c.bf16 %v593_v15, %v590_v11  ;;  %v717_v26 = vpack.c.bf16 %v384_v22, %v381_v12 }
 0x12a   :  { %v1422_v19 = vpop.f32.mrf.mxu1  ;;  %v1390_v29 = vpop.f32.mrf.mxu0 }
 0x12b   :  { %1448 = vmatprep.mubr.bf16.mxu1 %v718_v17 }
 0x12c   :  { %976 = vmatmul.mubr.bf16.gmra.mxu0 %v1242_v16  ;;  %1449 = vmatmul.mubr.bf16.gmra.mxu1 %v721_v14  ;;  %v606_v21 = vpop.f32.mrf.mxu1  ;;  %v397_v30 = vpop.f32.mrf.mxu0 }
 0x12d   :  { %983 = vmatprep.mubr.bf16.mxu0 %v714_v20 }
 0x12e   :  { %v1423_v23 = vpop.f32.mrf.mxu1  ;;  %v1391_v32 = vpop.f32.mrf.mxu0 }
 0x12f   :  { %v727_v24 = vpack.c.bf16 %v1423_v23, %v1422_v19  ;;  %v726_v38 = vpack.c.bf16 %v1391_v32, %v1390_v29 }
 0x130   :  { %v609_v25 = vpop.f32.mrf.mxu1  ;;  %v400_v34 = vpop.f32.mrf.mxu0 }
 0x131   :  { %v724_v28 = vpack.c.bf16 %v609_v25, %v606_v21  ;;  %v723_v35 = vpack.c.bf16 %v400_v34, %v397_v30 }
 0x133   :  { %1452 = vmatprep.mubr.bf16.mxu1 %v724_v28 }
 0x134   :  { %984 = vmatmul.mubr.bf16.gmra.mxu0 %v1243_v27  ;;  %1453 = vmatmul.mubr.bf16.gmra.mxu1 %v727_v24 }
 0x135   :  { %991 = vmatprep.mubr.bf16.mxu0 %v717_v26 }
 0x13c   :  { %992 = vmatmul.mubr.bf16.gmra.mxu0 %v1244_v31 }
 0x13d   :  { %999 = vmatprep.mubr.bf16.mxu0 %v720_v33 }
 0x144   :  { %1000 = vmatmul.mubr.bf16.gmra.mxu0 %v1245_v36 }
 0x145   :  { %1007 = vmatprep.mubr.bf16.mxu0 %v723_v35 }
 0x14c   :  { %1008 = vmatmul.mubr.bf16.gmra.mxu0 %v1246_v37 }
 0x14d   :  { %1015 = vmatprep.mubr.bf16.mxu0 %v726_v38 }
 0x154   :  { %1016 = vmatmul.mubr.bf16.gmra.mxu0 %v1247_v39 }
 0x1dc   :  { %v1296_v40 = vpop.f32.mrf.mxu0  ;;  %v1442_v41 = vpop.f32.mrf.mxu1 }
 0x1de   :  { %v1297_v42 = vpop.f32.mrf.mxu0  ;;  %v1058_v44 = vpop.f32.mrf.mxu1 }
 0x1df   :  { %v1298_v45 = vadd.f32 %v1297_v42, %v1296_v40 }
 0x1e0   :  { %v1299_v46 = vpop.f32.mrf.mxu0  ;;  %v1443_v47 = vpop.f32.mrf.mxu1 }
 0x1e1   :  { %v962_v48 = vadd.f32 %v1298_v45, %v1687_v43 }
 0x1e2   :  { %v1300_v49 = vpop.f32.mrf.mxu0  ;;  %v1061_v53 = vpop.f32.mrf.mxu1 }
 0x1e3   :  { %v1301_v50 = vadd.f32 %v1300_v49, %v1299_v46  ;;  %v1059_v51 = vadd.f32 %v1058_v44, %v962_v48 }
 0x1e4   :  { %v1302_v52 = vpop.f32.mrf.mxu0  ;;  %v1446_v59 = vpop.f32.mrf.mxu1 }
 0x1e5   :  { %1121 = vst [vmem:[#allocation11] sm:$0xff] %v1059_v51  ;;  %v965_v54 = vadd.f32 %v1301_v50, %v1687_v43 }
 0x1e6   :  { %v1303_v55 = vpop.f32.mrf.mxu0  ;;  %v1074_v1 = vpop.f32.mrf.mxu1 }
 0x1e7   :  { %v1304_v56 = vadd.f32 %v1303_v55, %v1302_v52  ;;  %v1062_v57 = vadd.f32 %v1061_v53, %v965_v54 }
 0x1e8   :  { %v1305_v58 = vpop.f32.mrf.mxu0  ;;  %v1447_v7 = vpop.f32.mrf.mxu1 }
 0x1e9   :  { %v970_v60 = vadd.f32 %v1304_v56, %v1687_v43  ;;  %1122 = vst [vmem:[#allocation11 + $0x8] sm:$0xff] %v1062_v57 }
 0x1ea   :  { %v1306_v61 = vpop.f32.mrf.mxu0  ;;  %v1077_v13 = vpop.f32.mrf.mxu1 }
 0x1eb   :  { %v1067_v62 = vadd.f32 %v1442_v41, %v970_v60  ;;  %v1307_v63 = vadd.f32 %v1306_v61, %v1305_v58 }
 0x1ec   :  { %v1308_v0 = vpop.f32.mrf.mxu0  ;;  %v1450_v19 = vpop.f32.mrf.mxu1 }
 0x1ed   :  { %1123 = vst [vmem:[#allocation11 + $0x10] sm:$0xff] %v1067_v62  ;;  %v973_v2 = vadd.f32 %v1307_v63, %v1687_v43 }
 0x1ee   :  { %v1309_v3 = vpop.f32.mrf.mxu0  ;;  %v1090_v25 = vpop.f32.mrf.mxu1 }
 0x1ef   :  { %v1070_v4 = vadd.f32 %v1443_v47, %v973_v2  ;;  %v1310_v5 = vadd.f32 %v1309_v3, %v1308_v0 }
 0x1f0   :  { %v1311_v6 = vpop.f32.mrf.mxu0  ;;  %v1451_v31 = vpop.f32.mrf.mxu1 }
 0x1f1   :  { %1124 = vst [vmem:[#allocation11 + $0x18] sm:$0xff] %v1070_v4  ;;  %v978_v8 = vadd.f32 %v1310_v5, %v1687_v43 }
 0x1f2   :  { %v1312_v9 = vpop.f32.mrf.mxu0  ;;  %v1093_v37 = vpop.f32.mrf.mxu1 }
 0x1f3   :  { %v1313_v10 = vadd.f32 %v1312_v9, %v1311_v6  ;;  %v1075_v11 = vadd.f32 %v1074_v1, %v978_v8 }
 0x1f4   :  { %v1314_v12 = vpop.f32.mrf.mxu0  ;;  %v1454_v46 = vpop.f32.mrf.mxu1 }
 0x1f5   :  { %1125 = vst [vmem:[#allocation11 + $0x20] sm:$0xff] %v1075_v11  ;;  %v981_v14 = vadd.f32 %v1313_v10, %v1687_v43 }
 0x1f6   :  { %v1315_v15 = vpop.f32.mrf.mxu0  ;;  %v1106_v51 = vpop.f32.mrf.mxu1 }
 0x1f7   :  { %v1316_v16 = vadd.f32 %v1315_v15, %v1314_v12  ;;  %v1078_v17 = vadd.f32 %v1077_v13, %v981_v14 }
 0x1f8   :  { %v1317_v18 = vpop.f32.mrf.mxu0  ;;  %v1455_v57 = vpop.f32.mrf.mxu1 }
 0x1f9   :  { %v986_v20 = vadd.f32 %v1316_v16, %v1687_v43  ;;  %1126 = vst [vmem:[#allocation11 + $0x28] sm:$0xff] %v1078_v17 }
 0x1fa   :  { %v1318_v21 = vpop.f32.mrf.mxu0  ;;  %v1109_v63 = vpop.f32.mrf.mxu1 }
 0x1fb   :  { %v1083_v22 = vadd.f32 %v1446_v59, %v986_v20  ;;  %v1319_v23 = vadd.f32 %v1318_v21, %v1317_v18 }
 0x1fc   :  { %v1320_v24 = vpop.f32.mrf.mxu0 }
 0x1fd   :  { %1127 = vst [vmem:[#allocation11 + $0x30] sm:$0xff] %v1083_v22  ;;  %v989_v26 = vadd.f32 %v1319_v23, %v1687_v43 }
 0x1fe   :  { %v1321_v27 = vpop.f32.mrf.mxu0 }
 0x1ff   :  { %v1086_v28 = vadd.f32 %v1447_v7, %v989_v26  ;;  %v1322_v29 = vadd.f32 %v1321_v27, %v1320_v24 }
 0x200   :  { %v1323_v30 = vpop.f32.mrf.mxu0 }
 0x201   :  { %1128 = vst [vmem:[#allocation11 + $0x38] sm:$0xff] %v1086_v28  ;;  %v994_v32 = vadd.f32 %v1322_v29, %v1687_v43 }
 0x202   :  { %v1324_v33 = vpop.f32.mrf.mxu0 }
 0x203   :  { %v1325_v34 = vadd.f32 %v1324_v33, %v1323_v30  ;;  %v1091_v35 = vadd.f32 %v1090_v25, %v994_v32 }
 0x204   :  { %v1326_v36 = vpop.f32.mrf.mxu0 }
 0x205   :  { %1129 = vst [vmem:[#allocation11 + $0x40] sm:$0xff] %v1091_v35  ;;  %v997_v38 = vadd.f32 %v1325_v34, %v1687_v43 }
 0x206   :  { %v1327_v39 = vpop.f32.mrf.mxu0 }
 0x207   :  { %v1328_v40 = vadd.f32 %v1327_v39, %v1326_v36  ;;  %v1094_v41 = vadd.f32 %v1093_v37, %v997_v38 }
 0x208   :  { %v1329_v42 = vpop.f32.mrf.mxu0 }
 0x209   :  { %v1002_v44 = vadd.f32 %v1328_v40, %v1687_v43  ;;  %1130 = vst [vmem:[#allocation11 + $0x48] sm:$0xff] %v1094_v41 }
 0x20a   :  { %v1330_v45 = vpop.f32.mrf.mxu0 }
 0x20b   :  { %v1099_v47 = vadd.f32 %v1450_v19, %v1002_v44  ;;  %v1331_v48 = vadd.f32 %v1330_v45, %v1329_v42 }
 0x20c   :  { %v1332_v49 = vpop.f32.mrf.mxu0 }
 0x20d   :  { %1131 = vst [vmem:[#allocation11 + $0x50] sm:$0xff] %v1099_v47  ;;  %v1005_v50 = vadd.f32 %v1331_v48, %v1687_v43 }
 0x20e   :  { %v1333_v52 = vpop.f32.mrf.mxu0 }
 0x20f   :  { %v1102_v53 = vadd.f32 %v1451_v31, %v1005_v50  ;;  %v1334_v54 = vadd.f32 %v1333_v52, %v1332_v49 }
 0x210   :  { %v1335_v55 = vpop.f32.mrf.mxu0 }
 0x211   :  { %1132 = vst [vmem:[#allocation11 + $0x58] sm:$0xff] %v1102_v53  ;;  %v1010_v56 = vadd.f32 %v1334_v54, %v1687_v43 }
 0x212   :  { %v1336_v58 = vpop.f32.mrf.mxu0 }
 0x213   :  { %v1107_v59 = vadd.f32 %v1106_v51, %v1010_v56  ;;  %v1337_v60 = vadd.f32 %v1336_v58, %v1335_v55 }
 0x214   :  { %v1338_v61 = vpop.f32.mrf.mxu0 }
 0x215   :  { %1133 = vst [vmem:[#allocation11 + $0x60] sm:$0xff] %v1107_v59  ;;  %v1013_v62 = vadd.f32 %v1337_v60, %v1687_v43 }
 0x216   :  { %v1339_v0 = vpop.f32.mrf.mxu0 }
 0x217   :  { %v1110_v1 = vadd.f32 %v1109_v63, %v1013_v62  ;;  %v1340_v2 = vadd.f32 %v1339_v0, %v1338_v61 }
 0x218   :  { %v1341_v3 = vpop.f32.mrf.mxu0 }
 0x219   :  { %1134 = vst [vmem:[#allocation11 + $0x68] sm:$0xff] %v1110_v1  ;;  %v1018_v4 = vadd.f32 %v1340_v2, %v1687_v43 }
 0x21a   :  { %v1342_v5 = vpop.f32.mrf.mxu0 }
 0x21b   :  { %v1115_v6 = vadd.f32 %v1454_v46, %v1018_v4  ;;  %v1343_v7 = vadd.f32 %v1342_v5, %v1341_v3 }
 0x21d   :  { %1135 = vst [vmem:[#allocation11 + $0x70] sm:$0xff] %v1115_v6  ;;  %v1021_v8 = vadd.f32 %v1343_v7, %v1687_v43 }
 0x21f   :  { %v1118_v9 = vadd.f32 %v1455_v57, %v1021_v8 }
 0x221   :  { %1136 = vst [vmem:[#allocation11 + $0x78] sm:$0xff] %v1118_v9 }
 0x222   :  { %1604 = shalt.err (!%p1601_p10)
}
 0x223   :  { %s1628_s15 = smov 128   ;;  %s1629_s16 = smov 8  }
 0x224   :  { %1148 = dma.vmem_to_hbm [thread:$0]  %s1143_s13, 2048, %s1713_s5, [#allocation5], %s1628_s15, %s1628_s15, %s1629_s16  }
 0x225   :  { %1619 = dma.done.wait [#allocation5], 2048  }
 0x226   :  { %1620 = vsyncadd [#allocation5], 4294965248 }
 0x227   :  { %1152 = vsyncpa [#allocation4], 1 }
 0x228   :  { %1153 = vsyncpa [#allocation7], 1 }
 0x229   :  { %1154 = vsyncpa [#allocation10], 1 }
 0x22a   :  { %1155 = vsyncpa [#allocation5], 1 }

</bundles_post_ra>
